<compile_context>
chip_gen: v6e
topology: v6e:2x2x1
jax: 0.10.0
libtpu: 0.0.40
codegen_flags: <defaults>
</compile_context>

<pallas_src>
import functools
import math

import numpy as np

import jax
import jax.numpy as jnp
from jax import lax
from jax.experimental import pallas as pl
from jax.experimental.pallas import tpu as pltpu


def _round_up(x, m):
    return (x + m - 1) // m * m


# ----------------------------- Pallas kernel ------------------------------ #

def _bilstm_layer_kernel(x_ref, len_ref, wi_ref, b_ref, whf_ref, whb_ref,
                         out_ref, g_sc, *, seq_len, batch):
    """One bidirectional, length-masked LSTM layer for one batch chunk.

    x_ref   : (T*Bc, E_in)   time-major input, flattened over (T, Bc)
    len_ref : (Bc, 1) int32  true sequence lengths (0 for padded rows)
    wi_ref  : (E_in, 8*Hp)   fused input weights [fwd gates | bwd gates]
    b_ref   : (1, 8*Hp) f32  fused bias (b_ih + b_hh), gate-padded
    whf/whb : (Hp, 4*Hp)     recurrent weights (fwd / bwd)
    out_ref : (T*Bc, 2*Hp)   fwd hidden -> [:, :Hp], bwd -> [:, Hp:]
    g_sc    : (T*Bc, 8*Hp)   hoisted fused input-projection scratch
    Gate column order is [i | f | o | g] (one sigmoid slab + one tanh slab).
    """
    T, Bc = seq_len, batch
    Hp = whf_ref.shape[0]
    lengths = len_ref[...]                                   # (Bc, 1) int32

    # ---- fused hoisted input projection: ONE big MXU matmul + one bias add ----
    proj = jnp.dot(x_ref[...], wi_ref[...],
                   preferred_element_type=jnp.float32) + b_ref[...]
    g_sc[...] = proj.astype(g_sc.dtype)

    def cell(gin, h, c, wh_ref):
        # gin already contains x @ W_ih + (b_ih + b_hh); add recurrent term.
        gates = gin + jnp.dot(h.astype(wh_ref.dtype), wh_ref[...],
                              preferred_element_type=jnp.float32)  # (Bc, 4Hp)
        sig = jax.nn.sigmoid(gates[:, 0:3 * Hp])                   # i | f | o
        i = sig[:, 0:Hp]
        f = sig[:, Hp:2 * Hp]
        o = sig[:, 2 * Hp:3 * Hp]
        g = jnp.tanh(gates[:, 3 * Hp:4 * Hp])
        c_new = f * c + i * g
        h_new = o * jnp.tanh(c_new)
        return h_new, c_new

    def step(s, carry):
        hf, cf, hb, cb = carry
        tb = T - 1 - s
        rf = pl.multiple_of(s * Bc, Bc)      # Bc % 8 == 0 -> sublane-aligned
        rb = pl.multiple_of(tb * Bc, Bc)

        # forward direction, t = s
        gin_f = g_sc[pl.ds(rf, Bc), 0:4 * Hp].astype(jnp.float32)
        hf_new, cf_new = cell(gin_f, hf, cf, whf_ref)
        mf = lengths > s                                     # (Bc, 1) bool
        hf = jnp.where(mf, hf_new, hf)
        cf = jnp.where(mf, cf_new, cf)
        out_ref[pl.ds(rf, Bc), 0:Hp] = (
            jnp.where(mf, hf_new, 0.0).astype(out_ref.dtype))

        # backward direction, t = T-1-s (independent; interleaved for ILP)
        gin_b = g_sc[pl.ds(rb, Bc), 4 * Hp:8 * Hp].astype(jnp.float32)
        hb_new, cb_new = cell(gin_b, hb, cb, whb_ref)
        mb = lengths > tb
        hb = jnp.where(mb, hb_new, hb)
        cb = jnp.where(mb, cb_new, cb)
        out_ref[pl.ds(rb, Bc), Hp:2 * Hp] = (
            jnp.where(mb, hb_new, 0.0).astype(out_ref.dtype))

        return hf, cf, hb, cb

    zeros = jnp.zeros((Bc, Hp), jnp.float32)
    carry = (zeros, zeros, zeros, zeros)

    # Manual unroll-by-2 of the serial time loop.
    def body2(s2, carry):
        carry = step(2 * s2, carry)
        carry = step(2 * s2 + 1, carry)
        return carry

    carry = lax.fori_loop(0, T // 2, body2, carry)
    if T % 2:                      # static remainder step
        carry = step(T - 1, carry)


def _vmem_limit_bytes(est):
    """Generation-aware scoped-VMEM limit: never undercut the resident estimate,
    never exceed ~90% of physical VMEM (128 MiB v5e/v6e, 64 MiB/TC v7x)."""
    try:
        phys = int(pltpu.get_tpu_info().vmem_capacity_bytes)
    except Exception:
        phys = 64 << 20            # conservative fallback (v7x per-TC VMEM)
    want = max(32 << 20, int(est) + (8 << 20))
    return min(want, int(phys * 0.9))


def bilstm_layer_pallas(x_ch, len_ch, params, seq_len, batch_chunk, hidden_pad,
                        *, out_dtype, scratch_dtype):
    """x_ch: (nC, T*Bc, E_in); len_ch: (nC, Bc, 1) i32 -> (nC, T*Bc, 2*Hp)."""
    nC, TB, Ein = x_ch.shape
    T, Bc, Hp = seq_len, batch_chunk, hidden_pad
    assert TB == T * Bc and Bc % 8 == 0 and Hp % 128 == 0
    wi, b, whf, whb = params

    in_it = jnp.dtype(x_ch.dtype).itemsize
    w_it = jnp.dtype(wi.dtype).itemsize
    rw_it = jnp.dtype(whf.dtype).itemsize
    out_it = jnp.dtype(out_dtype).itemsize
    sc_it = jnp.dtype(scratch_dtype).itemsize
    est = (2 * TB * Ein * in_it                 # x chunk (double-buffered)
           + 2 * TB * 2 * Hp * out_it           # out chunk (double-buffered)
           + TB * 8 * Hp * sc_it                # fused gate-projection scratch
           + 2 * Ein * 8 * Hp * w_it            # fused input weights
           + 2 * 2 * Hp * 4 * Hp * rw_it        # recurrent weights (fwd + bwd)
           + 2 * 8 * Hp * 4 + 2 * Bc * 4)       # bias + lengths
    vmem_limit = _vmem_limit_bytes(est)

    kernel = functools.partial(_bilstm_layer_kernel, seq_len=T, batch=Bc)
    grid_spec = pltpu.PrefetchScalarGridSpec(
        num_scalar_prefetch=0,
        grid=(nC,),
        in_specs=[
            pl.BlockSpec((None, TB, Ein), lambda c: (c, 0, 0)),
            pl.BlockSpec((None, Bc, 1), lambda c: (c, 0, 0)),
            pl.BlockSpec(wi.shape, lambda c: (0, 0)),    # resident across chunks
            pl.BlockSpec(b.shape, lambda c: (0, 0)),
            pl.BlockSpec(whf.shape, lambda c: (0, 0)),
            pl.BlockSpec(whb.shape, lambda c: (0, 0)),
        ],
        out_specs=pl.BlockSpec((None, TB, 2 * Hp), lambda c: (c, 0, 0)),
        scratch_shapes=[pltpu.VMEM((TB, 8 * Hp), scratch_dtype)],
    )
    return pl.pallas_call(
        kernel,
        out_shape=jax.ShapeDtypeStruct((nC, TB, 2 * Hp), out_dtype),
        grid_spec=grid_spec,
        compiler_params=pltpu.CompilerParams(
            dimension_semantics=("parallel",),
            vmem_limit_bytes=vmem_limit),
    )(x_ch, len_ch, wi, b, whf, whb)


# --------------------------- weight packing utils -------------------------- #

_GATE_ORDER = (0, 1, 3, 2)   # PyTorch [i|f|g|o] -> kernel [i|f|o|g]


def _repack_gate_cols(w, H, Hp):
    """(..., 4H) [i|f|g|o] -> (..., 4Hp) [i|f|o|g], each block zero-padded to Hp."""
    pad = [(0, 0)] * (w.ndim - 1) + [(0, Hp - H)]
    blocks = [jnp.pad(w[..., g * H:(g + 1) * H], pad) for g in _GATE_ORDER]
    return jnp.concatenate(blocks, axis=-1)


def _scatter_bidir_rows(w, H, Hp):
    """(2H, X) -> (2Hp, X): fwd rows [0:H]->[0:H], bwd rows [H:2H]->[Hp:Hp+H]."""
    out = jnp.zeros((2 * Hp, w.shape[1]), w.dtype)
    out = out.at[0:H].set(w[0:H])
    out = out.at[Hp:Hp + H].set(w[H:2 * H])
    return out


# ----------------------------- Model wrapper ------------------------------ #

def _uniform(key, shape, k):
    return jax.random.uniform(key, shape, jnp.float32, minval=-k, maxval=k)


class InputEncodingPallas:
    """JAX/Pallas port of ESIM's InputEncoding module."""

    def __init__(self, embedding, vocab_size, embedding_dim, hidden_dim,
                 num_layers, key):
        k_emb, k_lstm = jax.random.split(key)
        if embedding is not None:
            self.embed_table = jnp.asarray(embedding, jnp.float32)
            self.embedding_dim = self.embed_table.shape[1]
        else:
            # nn.Embedding default init: N(0, 1)
            self.embed_table = jax.random.normal(
                k_emb, (vocab_size, embedding_dim), jnp.float32)
            self.embedding_dim = embedding_dim
        self.hidden_dim = hidden_dim
        self.num_layers = num_layers

        H = hidden_dim
        Hp = _round_up(H, 128)            # lane-aligned gate blocks / outputs
        Ep = _round_up(self.embedding_dim, 128)
        self.hidden_pad = Hp
        self.embed_pad = Ep
        self.embed_table_padded = jnp.pad(
            self.embed_table, ((0, 0), (0, Ep - self.embedding_dim)))

        bound = 1.0 / math.sqrt(H)        # PyTorch LSTM default init
        self.layer_params = []            # real weights (reference / semantics)
        self.layer_params_packed = []     # fused / repacked / padded (kernel)
        keys = jax.random.split(k_lstm, num_layers)
        for layer in range(num_layers):
            e_in = self.embedding_dim if layer == 0 else 2 * H
            ks = jax.random.split(keys[layer], 8)
            wif = _uniform(ks[0], (e_in, 4 * H), bound)
            whf = _uniform(ks[1], (H, 4 * H), bound)
            bf = (_uniform(ks[2], (1, 4 * H), bound)
                  + _uniform(ks[3], (1, 4 * H), bound))
            wib = _uniform(ks[4], (e_in, 4 * H), bound)
            whb = _uniform(ks[5], (H, 4 * H), bound)
            bb = (_uniform(ks[6], (1, 4 * H), bound)
                  + _uniform(ks[7], (1, 4 * H), bound))
            self.layer_params.append((wif, whf, bf, wib, whb, bb))

            # Zero-pad / repack for the kernel.  Padded units stay exactly zero
            # through the recurrence, so real outputs are unchanged.
            if layer == 0:
                pad_in = lambda w: jnp.pad(w, ((0, Ep - e_in), (0, 0)))
            else:
                pad_in = lambda w: _scatter_bidir_rows(w, H, Hp)
            wif_p = _repack_gate_cols(pad_in(wif), H, Hp)
            wib_p = _repack_gate_cols(pad_in(wib), H, Hp)
            wi_fused = jnp.concatenate([wif_p, wib_p], axis=1)       # (Ein, 8Hp)
            b_fused = jnp.concatenate([_repack_gate_cols(bf, H, Hp),
                                       _repack_gate_cols(bb, H, Hp)], axis=1)
            whf_p = _repack_gate_cols(jnp.pad(whf, ((0, Hp - H), (0, 0))), H, Hp)
            whb_p = _repack_gate_cols(jnp.pad(whb, ((0, Hp - H), (0, 0))), H, Hp)
            self.layer_params_packed.append((wi_fused, b_fused, whf_p, whb_p))

    def __call__(self, x, lengths, matmul_dtype=jnp.float32,
                 recurrent_dtype=jnp.float32, batch_chunk=None):
        """x: (B, T) int32 ids; lengths: (B,) int32. -> (B, max_len, 2H) f32."""
        B, T = x.shape
        H, Hp, Ep = self.hidden_dim, self.hidden_pad, self.embed_pad

        # Host-side max length: lengths is an input array -> no compute sync.
        max_len = int(np.max(np.asarray(lengths)))

        # Batch-chunked ("parallel") grid layout.
        Bc = batch_chunk if batch_chunk is not None else min(64, _round_up(B, 8))
        Bc = max(8, _round_up(Bc, 8))
        Bp = _round_up(B, Bc)
        nC = Bp // Bc

        x_p = jnp.pad(jnp.asarray(x, jnp.int32), ((0, Bp - B), (0, 0)))
        len_p = jnp.pad(jnp.asarray(lengths, jnp.int32), (0, Bp - B))
        len_ch = len_p.reshape(nC, Bc, 1)

        # Embedding gather directly in chunked time-major order: (nC, T, Bc, Ep)
        # (only the tiny int32 id array is transposed).
        ids = x_p.reshape(nC, Bc, T).transpose(0, 2, 1)
        table = self.embed_table_padded.astype(matmul_dtype)
        inp = table[ids].reshape(nC, T * Bc, Ep)

        n_layers = len(self.layer_params_packed)
        out = None
        for li, (wi, b, whf, whb) in enumerate(self.layer_params_packed):
            last = (li == n_layers - 1)
            out_dtype = jnp.float32 if last else matmul_dtype
            params = (wi.astype(matmul_dtype), b,
                      whf.astype(recurrent_dtype), whb.astype(recurrent_dtype))
            out = bilstm_layer_pallas(inp, len_ch, params, T, Bc, Hp,
                                      out_dtype=out_dtype,
                                      scratch_dtype=matmul_dtype)
            inp = out                       # already matmul_dtype for li < last

        # Un-chunk: (nC, T*Bc, 2Hp) -> (Bp, T, 2Hp), then truncate + un-pad lanes.
        out = out.reshape(nC, T, Bc, 2 * Hp).transpose(0, 2, 1, 3)
        out = out.reshape(Bp, T, 2 * Hp)[:B, :max_len]
        if Hp == H:
            return out[..., :2 * H]
        return jnp.concatenate([out[..., :H], out[..., Hp:Hp + H]], axis=-1)


# --------------------------- Pure-JAX reference ---------------------------- #

def _ref_bilstm_layer(x_bt, lengths, params, H):
    """Reference length-masked bidirectional LSTM layer (batch-first, f32)."""
    wif, whf, bf, wib, whb, bb = params
    B, T, _ = x_bt.shape

    def run_direction(wi, wh, b, reverse):
        def step(carry, t):
            h, c = carry
            xt = x_bt[:, t, :]
            gates = xt @ wi + h @ wh + b
            i = jax.nn.sigmoid(gates[:, :H])
            f = jax.nn.sigmoid(gates[:, H:2 * H])
            g = jnp.tanh(gates[:, 2 * H:3 * H])
            o = jax.nn.sigmoid(gates[:, 3 * H:])
            c_new = f * c + i * g
            h_new = o * jnp.tanh(c_new)
            mask = (lengths > t)[:, None]
            h = jnp.where(mask, h_new, h)
            c = jnp.where(mask, c_new, c)
            return (h, c), jnp.where(mask, h_new, 0.0)

        ts = jnp.arange(T - 1, -1, -1) if reverse else jnp.arange(T)
        init = (jnp.zeros((B, H), jnp.float32), jnp.zeros((B, H), jnp.float32))
        _, outs = lax.scan(step, init, ts)
        if reverse:
            outs = outs[::-1]
        return jnp.transpose(outs, (1, 0, 2))

    of = run_direction(wif, whf, bf, reverse=False)
    ob = run_direction(wib, whb, bb, reverse=True)
    return jnp.concatenate([of, ob], axis=-1)


def _ref_forward(model, x, lengths):
    out = model.embed_table[x]
    for params in model.layer_params:
        out = _ref_bilstm_layer(out, lengths, params, model.hidden_dim)
    max_len = int(np.max(np.asarray(lengths)))
    return out[:, :max_len, :]


# ---------------------------------- main ----------------------------------- #

if __name__ == "__main__":
    B, T, VOCAB, E, H, L = 2, 8, 50, 16, 32, 2

    key = jax.random.PRNGKey(0)
    k_model, k_x, k_x2, k_len2 = jax.random.split(key, 4)

    model = InputEncodingPallas(embedding=None, vocab_size=VOCAB,
                                embedding_dim=E, hidden_dim=H,
                                num_layers=L, key=k_model)

    x = jax.random.randint(k_x, (B, T), 0, VOCAB, dtype=jnp.int32)
    lengths = jnp.array([7, 5], dtype=jnp.int32)

    # f32 path (single batch chunk)
    out = jax.block_until_ready(model(x, lengths))
    max_len = 7
    assert out.shape == (B, max_len, 2 * H), out.shape
    # Padded positions (t >= length) must be exactly zero (pad_packed_sequence).
    assert bool(jnp.all(out[1, 5:, :] == 0.0))

    ref = _ref_forward(model, x, lengths)
    err = float(jnp.max(jnp.abs(out - ref)))
    assert err < 2e-3, err

    # bf16 MXU-operand path (f32 gate math, f32 recurrent matmul by default).
    out_bf16 = jax.block_until_ready(
        model(x, lengths, matmul_dtype=jnp.bfloat16))
    assert out_bf16.shape == (B, max_len, 2 * H), out_bf16.shape
    err_bf16 = float(jnp.max(jnp.abs(out_bf16 - ref)))
    assert err_bf16 < 1e-1, err_bf16

    # Multi-chunk grid path (exercises the "parallel" batch-chunk axis, nC=2).
    B2 = 12
    x2 = jax.random.randint(k_x2, (B2, T), 0, VOCAB, dtype=jnp.int32)
    len2 = jax.random.randint(k_len2, (B2,), 1, T + 1, dtype=jnp.int32)
    out2 = jax.block_until_ready(model(x2, len2, batch_chunk=8))
    ref2 = _ref_forward(model, x2, len2)
    assert out2.shape == ref2.shape, (out2.shape, ref2.shape)
    err2 = float(jnp.max(jnp.abs(out2 - ref2)))
    assert err2 < 2e-3, err2

    print("KERNEL_OK")
</pallas_src>

<mosaic_0001>
module attributes {stable_mosaic.version = 11 : i64} {
  func.func @_bilstm_layer_kernel(%arg0: i32, %arg1: memref<1x64x128xf32, #tpu.memory_space<vmem>>, %arg2: memref<1x8x1xi32, #tpu.memory_space<vmem>>, %arg3: memref<128x1024xf32, #tpu.memory_space<vmem>>, %arg4: memref<1x1024xf32, #tpu.memory_space<vmem>>, %arg5: memref<128x512xf32, #tpu.memory_space<vmem>>, %arg6: memref<128x512xf32, #tpu.memory_space<vmem>>, %arg7: memref<1x64x256xf32, #tpu.memory_space<vmem>>, %arg8: memref<64x1024xf32, #tpu.memory_space<vmem>>) attributes {dimension_semantics = [#tpu.dimension_semantics<parallel>], iteration_bounds = array<i64: 1>, scalar_prefetch = 0 : i64, scratch_operands = 1 : i64, tpu.core_type = #tpu.core_type<tc>, window_params = [{transform_indices = @transform_0, window_bounds = array<i64: 1, 64, 128>}, {transform_indices = @transform_1, window_bounds = array<i64: 1, 8, 1>}, {pipeline_mode = #tpu.pipeline_mode<synchronous>, transform_indices = @transform_2, window_bounds = array<i64: 128, 1024>}, {pipeline_mode = #tpu.pipeline_mode<synchronous>, transform_indices = @transform_3, window_bounds = array<i64: 1, 1024>}, {pipeline_mode = #tpu.pipeline_mode<synchronous>, transform_indices = @transform_4, window_bounds = array<i64: 128, 512>}, {pipeline_mode = #tpu.pipeline_mode<synchronous>, transform_indices = @transform_5, window_bounds = array<i64: 128, 512>}, {transform_indices = @transform_6, window_bounds = array<i64: 1, 64, 256>}]} {
    %c0 = arith.constant 0 : index
    %c0_0 = arith.constant 0 : index
    %c0_1 = arith.constant 0 : index
    %0 = vector.load %arg2[%c0, %c0_0, %c0_1] : memref<1x8x1xi32, #tpu.memory_space<vmem>>, vector<1x8x1xi32>
    %1 = vector.shape_cast %0 : vector<1x8x1xi32> to vector<8x1xi32>
    %c0_2 = arith.constant 0 : index
    %c0_3 = arith.constant 0 : index
    %c0_4 = arith.constant 0 : index
    %2 = vector.load %arg1[%c0_2, %c0_3, %c0_4] : memref<1x64x128xf32, #tpu.memory_space<vmem>>, vector<1x64x128xf32>
    %3 = vector.shape_cast %2 : vector<1x64x128xf32> to vector<64x128xf32>
    %c0_5 = arith.constant 0 : index
    %c0_6 = arith.constant 0 : index
    %4 = vector.load %arg3[%c0_5, %c0_6] : memref<128x1024xf32, #tpu.memory_space<vmem>>, vector<128x1024xf32>
    %cst = arith.constant dense<0.000000e+00> : vector<64x1024xf32>
    %5 = tpu.matmul %3, %4, %cst {dimension_numbers = #tpu.dot_dimension_numbers<[1], [0], [0], [1], [0, 0, 1, 1], [], []>} : vector<64x128xf32>, vector<128x1024xf32>, vector<64x1024xf32> -> vector<64x1024xf32>
    %c0_7 = arith.constant 0 : index
    %c0_8 = arith.constant 0 : index
    %6 = vector.load %arg4[%c0_7, %c0_8] : memref<1x1024xf32, #tpu.memory_space<vmem>>, vector<1x1024xf32>
    %7 = vector.broadcast %6 : vector<1x1024xf32> to vector<64x1024xf32>
    %8 = arith.addf %5, %7 : vector<64x1024xf32>
    %c0_9 = arith.constant 0 : index
    %c0_10 = arith.constant 0 : index
    %9 = vector.load %arg8[%c0_9, %c0_10] : memref<64x1024xf32, #tpu.memory_space<vmem>>, vector<64x1024xf32>
    tpu.vector_store %arg8[%c0_9, %c0_10], %8 {strides = array<i32>} : memref<64x1024xf32, #tpu.memory_space<vmem>>, vector<64x1024xf32>,
    %cst_11 = arith.constant 0.000000e+00 : f32
    %10 = vector.broadcast %cst_11 : f32 to vector<8x128xf32>
    %c0_i32 = arith.constant 0 : i32
    %c4_i32 = arith.constant 4 : i32
    %11 = arith.addi %c0_i32, %c4_i32 : i32
    %c1_i32 = arith.constant 1 : i32
    %12:4 = scf.for %arg9 = %c0_i32 to %11 step %c1_i32 iter_args(%arg10 = %10, %arg11 = %10, %arg12 = %10, %arg13 = %10) -> (vector<8x128xf32>, vector<8x128xf32>, vector<8x128xf32>, vector<8x128xf32>)  : i32 {
      %c2_i32 = arith.constant 2 : i32
      %13 = arith.muli %c2_i32, %arg9 : i32
      %c7_i32 = arith.constant 7 : i32
      %14 = arith.subi %c7_i32, %13 : i32
      %c8_i32 = arith.constant 8 : i32
      %15 = arith.muli %13, %c8_i32 : i32
      %16 = tpu.assume_multiple %15, 8 : i32
      %c8_i32_13 = arith.constant 8 : i32
      %17 = arith.muli %14, %c8_i32_13 : i32
      %18 = tpu.assume_multiple %17, 8 : i32
      %19 = arith.index_cast %16 : i32 to index
      %c0_14 = arith.constant 0 : index
      %20 = vector.load %arg8[%19, %c0_14] : memref<64x1024xf32, #tpu.memory_space<vmem>>, vector<8x512xf32>
      %c0_15 = arith.constant 0 : index
      %c0_16 = arith.constant 0 : index
      %21 = vector.load %arg5[%c0_15, %c0_16] : memref<128x512xf32, #tpu.memory_space<vmem>>, vector<128x512xf32>
      %cst_17 = arith.constant dense<0.000000e+00> : vector<8x512xf32>
      %22 = tpu.matmul %arg10, %21, %cst_17 {dimension_numbers = #tpu.dot_dimension_numbers<[1], [0], [0], [1], [0, 0, 1, 1], [], []>} : vector<8x128xf32>, vector<128x512xf32>, vector<8x512xf32> -> vector<8x512xf32>
      %23 = arith.addf %20, %22 : vector<8x512xf32>
      %24 = vector.extract_strided_slice %23 {offsets = [0, 0], sizes = [8, 384], strides = [1, 1]} : vector<8x512xf32> to vector<8x384xf32>
      %25 = arith.negf %24 : vector<8x384xf32>
      %26 = math.exp %25 : vector<8x384xf32>
      %cst_18 = arith.constant 1.000000e+00 : f32
      %27 = vector.broadcast %cst_18 : f32 to vector<8x384xf32>
      %28 = arith.addf %27, %26 : vector<8x384xf32>
      %29 = arith.divf %27, %28 : vector<8x384xf32>
      %30 = vector.extract_strided_slice %29 {offsets = [0, 0], sizes = [8, 128], strides = [1, 1]} : vector<8x384xf32> to vector<8x128xf32>
      %31 = vector.extract_strided_slice %29 {offsets = [0, 128], sizes = [8, 128], strides = [1, 1]} : vector<8x384xf32> to vector<8x128xf32>
      %32 = vector.extract_strided_slice %29 {offsets = [0, 256], sizes = [8, 128], strides = [1, 1]} : vector<8x384xf32> to vector<8x128xf32>
      %33 = vector.extract_strided_slice %23 {offsets = [0, 384], sizes = [8, 128], strides = [1, 1]} : vector<8x512xf32> to vector<8x128xf32>
      %34 = math.tanh %33 : vector<8x128xf32>
      %35 = arith.mulf %31, %arg11 : vector<8x128xf32>
      %36 = arith.mulf %30, %34 : vector<8x128xf32>
      %37 = arith.addf %35, %36 : vector<8x128xf32>
      %38 = math.tanh %37 : vector<8x128xf32>
      %39 = arith.mulf %32, %38 : vector<8x128xf32>
      %40 = vector.broadcast %13 : i32 to vector<8x1xi32>
      %41 = arith.cmpi sgt, %1, %40 : vector<8x1xi32>
      %42 = vector.shape_cast %41 : vector<8x1xi1> to vector<8x1xi1>
      %43 = vector.broadcast %42 : vector<8x1xi1> to vector<8x128xi1>
      %44 = arith.select %43, %39, %arg10 : vector<8x128xi1>, vector<8x128xf32>
      %45 = vector.shape_cast %41 : vector<8x1xi1> to vector<8x1xi1>
      %46 = vector.broadcast %45 : vector<8x1xi1> to vector<8x128xi1>
      %47 = arith.select %46, %37, %arg11 : vector<8x128xi1>, vector<8x128xf32>
      %cst_19 = arith.constant 0.000000e+00 : f32
      %48 = vector.shape_cast %41 : vector<8x1xi1> to vector<8x1xi1>
      %49 = vector.broadcast %48 : vector<8x1xi1> to vector<8x128xi1>
      %50 = vector.broadcast %cst_19 : f32 to vector<8x128xf32>
      %51 = arith.select %49, %39, %50 : vector<8x128xi1>, vector<8x128xf32>
      %c0_20 = arith.constant 0 : index
      %52 = arith.index_cast %16 : i32 to index
      %c0_21 = arith.constant 0 : index
      %53 = vector.load %arg7[%c0_20, %52, %c0_21] : memref<1x64x256xf32, #tpu.memory_space<vmem>>, vector<1x8x128xf32>
      %54 = vector.shape_cast %53 : vector<1x8x128xf32> to vector<8x128xf32>
      %55 = vector.shape_cast %51 : vector<8x128xf32> to vector<1x8x128xf32>
      tpu.vector_store %arg7[%c0_20, %52, %c0_21], %55 {strides = array<i32>} : memref<1x64x256xf32, #tpu.memory_space<vmem>>, vector<1x8x128xf32>,
      %56 = arith.index_cast %18 : i32 to index
      %c512 = arith.constant 512 : index
      %57 = vector.load %arg8[%56, %c512] : memref<64x1024xf32, #tpu.memory_space<vmem>>, vector<8x512xf32>
      %c0_22 = arith.constant 0 : index
      %c0_23 = arith.constant 0 : index
      %58 = vector.load %arg6[%c0_22, %c0_23] : memref<128x512xf32, #tpu.memory_space<vmem>>, vector<128x512xf32>
      %cst_24 = arith.constant dense<0.000000e+00> : vector<8x512xf32>
      %59 = tpu.matmul %arg12, %58, %cst_24 {dimension_numbers = #tpu.dot_dimension_numbers<[1], [0], [0], [1], [0, 0, 1, 1], [], []>} : vector<8x128xf32>, vector<128x512xf32>, vector<8x512xf32> -> vector<8x512xf32>
      %60 = arith.addf %57, %59 : vector<8x512xf32>
      %61 = vector.extract_strided_slice %60 {offsets = [0, 0], sizes = [8, 384], strides = [1, 1]} : vector<8x512xf32> to vector<8x384xf32>
      %62 = arith.negf %61 : vector<8x384xf32>
      %63 = math.exp %62 : vector<8x384xf32>
      %cst_25 = arith.constant 1.000000e+00 : f32
      %64 = vector.broadcast %cst_25 : f32 to vector<8x384xf32>
      %65 = arith.addf %64, %63 : vector<8x384xf32>
      %66 = arith.divf %64, %65 : vector<8x384xf32>
      %67 = vector.extract_strided_slice %66 {offsets = [0, 0], sizes = [8, 128], strides = [1, 1]} : vector<8x384xf32> to vector<8x128xf32>
      %68 = vector.extract_strided_slice %66 {offsets = [0, 128], sizes = [8, 128], strides = [1, 1]} : vector<8x384xf32> to vector<8x128xf32>
      %69 = vector.extract_strided_slice %66 {offsets = [0, 256], sizes = [8, 128], strides = [1, 1]} : vector<8x384xf32> to vector<8x128xf32>
      %70 = vector.extract_strided_slice %60 {offsets = [0, 384], sizes = [8, 128], strides = [1, 1]} : vector<8x512xf32> to vector<8x128xf32>
      %71 = math.tanh %70 : vector<8x128xf32>
      %72 = arith.mulf %68, %arg13 : vector<8x128xf32>
      %73 = arith.mulf %67, %71 : vector<8x128xf32>
      %74 = arith.addf %72, %73 : vector<8x128xf32>
      %75 = math.tanh %74 : vector<8x128xf32>
      %76 = arith.mulf %69, %75 : vector<8x128xf32>
      %77 = vector.broadcast %14 : i32 to vector<8x1xi32>
      %78 = arith.cmpi sgt, %1, %77 : vector<8x1xi32>
      %79 = vector.shape_cast %78 : vector<8x1xi1> to vector<8x1xi1>
      %80 = vector.broadcast %79 : vector<8x1xi1> to vector<8x128xi1>
      %81 = arith.select %80, %76, %arg12 : vector<8x128xi1>, vector<8x128xf32>
      %82 = vector.shape_cast %78 : vector<8x1xi1> to vector<8x1xi1>
      %83 = vector.broadcast %82 : vector<8x1xi1> to vector<8x128xi1>
      %84 = arith.select %83, %74, %arg13 : vector<8x128xi1>, vector<8x128xf32>
      %cst_26 = arith.constant 0.000000e+00 : f32
      %85 = vector.shape_cast %78 : vector<8x1xi1> to vector<8x1xi1>
      %86 = vector.broadcast %85 : vector<8x1xi1> to vector<8x128xi1>
      %87 = vector.broadcast %cst_26 : f32 to vector<8x128xf32>
      %88 = arith.select %86, %76, %87 : vector<8x128xi1>, vector<8x128xf32>
      %c0_27 = arith.constant 0 : index
      %89 = arith.index_cast %18 : i32 to index
      %c128 = arith.constant 128 : index
      %90 = vector.load %arg7[%c0_27, %89, %c128] : memref<1x64x256xf32, #tpu.memory_space<vmem>>, vector<1x8x128xf32>
      %91 = vector.shape_cast %90 : vector<1x8x128xf32> to vector<8x128xf32>
      %92 = vector.shape_cast %88 : vector<8x128xf32> to vector<1x8x128xf32>
      tpu.vector_store %arg7[%c0_27, %89, %c128], %92 {strides = array<i32>} : memref<1x64x256xf32, #tpu.memory_space<vmem>>, vector<1x8x128xf32>,
      %c2_i32_28 = arith.constant 2 : i32
      %93 = arith.muli %c2_i32_28, %arg9 : i32
      %c1_i32_29 = arith.constant 1 : i32
      %94 = arith.addi %93, %c1_i32_29 : i32
      %c7_i32_30 = arith.constant 7 : i32
      %95 = arith.subi %c7_i32_30, %94 : i32
      %c8_i32_31 = arith.constant 8 : i32
      %96 = arith.muli %94, %c8_i32_31 : i32
      %97 = tpu.assume_multiple %96, 8 : i32
      %c8_i32_32 = arith.constant 8 : i32
      %98 = arith.muli %95, %c8_i32_32 : i32
      %99 = tpu.assume_multiple %98, 8 : i32
      %100 = arith.index_cast %97 : i32 to index
      %c0_33 = arith.constant 0 : index
      %101 = vector.load %arg8[%100, %c0_33] : memref<64x1024xf32, #tpu.memory_space<vmem>>, vector<8x512xf32>
      %c0_34 = arith.constant 0 : index
      %c0_35 = arith.constant 0 : index
      %102 = vector.load %arg5[%c0_34, %c0_35] : memref<128x512xf32, #tpu.memory_space<vmem>>, vector<128x512xf32>
      %cst_36 = arith.constant dense<0.000000e+00> : vector<8x512xf32>
      %103 = tpu.matmul %44, %102, %cst_36 {dimension_numbers = #tpu.dot_dimension_numbers<[1], [0], [0], [1], [0, 0, 1, 1], [], []>} : vector<8x128xf32>, vector<128x512xf32>, vector<8x512xf32> -> vector<8x512xf32>
      %104 = arith.addf %101, %103 : vector<8x512xf32>
      %105 = vector.extract_strided_slice %104 {offsets = [0, 0], sizes = [8, 384], strides = [1, 1]} : vector<8x512xf32> to vector<8x384xf32>
      %106 = arith.negf %105 : vector<8x384xf32>
      %107 = math.exp %106 : vector<8x384xf32>
      %cst_37 = arith.constant 1.000000e+00 : f32
      %108 = vector.broadcast %cst_37 : f32 to vector<8x384xf32>
      %109 = arith.addf %108, %107 : vector<8x384xf32>
      %110 = arith.divf %108, %109 : vector<8x384xf32>
      %111 = vector.extract_strided_slice %110 {offsets = [0, 0], sizes = [8, 128], strides = [1, 1]} : vector<8x384xf32> to vector<8x128xf32>
      %112 = vector.extract_strided_slice %110 {offsets = [0, 128], sizes = [8, 128], strides = [1, 1]} : vector<8x384xf32> to vector<8x128xf32>
      %113 = vector.extract_strided_slice %110 {offsets = [0, 256], sizes = [8, 128], strides = [1, 1]} : vector<8x384xf32> to vector<8x128xf32>
      %114 = vector.extract_strided_slice %104 {offsets = [0, 384], sizes = [8, 128], strides = [1, 1]} : vector<8x512xf32> to vector<8x128xf32>
      %115 = math.tanh %114 : vector<8x128xf32>
      %116 = arith.mulf %112, %47 : vector<8x128xf32>
      %117 = arith.mulf %111, %115 : vector<8x128xf32>
      %118 = arith.addf %116, %117 : vector<8x128xf32>
      %119 = math.tanh %118 : vector<8x128xf32>
      %120 = arith.mulf %113, %119 : vector<8x128xf32>
      %121 = vector.broadcast %94 : i32 to vector<8x1xi32>
      %122 = arith.cmpi sgt, %1, %121 : vector<8x1xi32>
      %123 = vector.shape_cast %122 : vector<8x1xi1> to vector<8x1xi1>
      %124 = vector.broadcast %123 : vector<8x1xi1> to vector<8x128xi1>
      %125 = arith.select %124, %120, %44 : vector<8x128xi1>, vector<8x128xf32>
      %126 = vector.shape_cast %122 : vector<8x1xi1> to vector<8x1xi1>
      %127 = vector.broadcast %126 : vector<8x1xi1> to vector<8x128xi1>
      %128 = arith.select %127, %118, %47 : vector<8x128xi1>, vector<8x128xf32>
      %cst_38 = arith.constant 0.000000e+00 : f32
      %129 = vector.shape_cast %122 : vector<8x1xi1> to vector<8x1xi1>
      %130 = vector.broadcast %129 : vector<8x1xi1> to vector<8x128xi1>
      %131 = vector.broadcast %cst_38 : f32 to vector<8x128xf32>
      %132 = arith.select %130, %120, %131 : vector<8x128xi1>, vector<8x128xf32>
      %c0_39 = arith.constant 0 : index
      %133 = arith.index_cast %97 : i32 to index
      %c0_40 = arith.constant 0 : index
      %134 = vector.load %arg7[%c0_39, %133, %c0_40] : memref<1x64x256xf32, #tpu.memory_space<vmem>>, vector<1x8x128xf32>
      %135 = vector.shape_cast %134 : vector<1x8x128xf32> to vector<8x128xf32>
      %136 = vector.shape_cast %132 : vector<8x128xf32> to vector<1x8x128xf32>
      tpu.vector_store %arg7[%c0_39, %133, %c0_40], %136 {strides = array<i32>} : memref<1x64x256xf32, #tpu.memory_space<vmem>>, vector<1x8x128xf32>,
      %137 = arith.index_cast %99 : i32 to index
      %c512_41 = arith.constant 512 : index
      %138 = vector.load %arg8[%137, %c512_41] : memref<64x1024xf32, #tpu.memory_space<vmem>>, vector<8x512xf32>
      %c0_42 = arith.constant 0 : index
      %c0_43 = arith.constant 0 : index
      %139 = vector.load %arg6[%c0_42, %c0_43] : memref<128x512xf32, #tpu.memory_space<vmem>>, vector<128x512xf32>
      %cst_44 = arith.constant dense<0.000000e+00> : vector<8x512xf32>
      %140 = tpu.matmul %81, %139, %cst_44 {dimension_numbers = #tpu.dot_dimension_numbers<[1], [0], [0], [1], [0, 0, 1, 1], [], []>} : vector<8x128xf32>, vector<128x512xf32>, vector<8x512xf32> -> vector<8x512xf32>
      %141 = arith.addf %138, %140 : vector<8x512xf32>
      %142 = vector.extract_strided_slice %141 {offsets = [0, 0], sizes = [8, 384], strides = [1, 1]} : vector<8x512xf32> to vector<8x384xf32>
      %143 = arith.negf %142 : vector<8x384xf32>
      %144 = math.exp %143 : vector<8x384xf32>
      %cst_45 = arith.constant 1.000000e+00 : f32
      %145 = vector.broadcast %cst_45 : f32 to vector<8x384xf32>
      %146 = arith.addf %145, %144 : vector<8x384xf32>
      %147 = arith.divf %145, %146 : vector<8x384xf32>
      %148 = vector.extract_strided_slice %147 {offsets = [0, 0], sizes = [8, 128], strides = [1, 1]} : vector<8x384xf32> to vector<8x128xf32>
      %149 = vector.extract_strided_slice %147 {offsets = [0, 128], sizes = [8, 128], strides = [1, 1]} : vector<8x384xf32> to vector<8x128xf32>
      %150 = vector.extract_strided_slice %147 {offsets = [0, 256], sizes = [8, 128], strides = [1, 1]} : vector<8x384xf32> to vector<8x128xf32>
      %151 = vector.extract_strided_slice %141 {offsets = [0, 384], sizes = [8, 128], strides = [1, 1]} : vector<8x512xf32> to vector<8x128xf32>
      %152 = math.tanh %151 : vector<8x128xf32>
      %153 = arith.mulf %149, %84 : vector<8x128xf32>
      %154 = arith.mulf %148, %152 : vector<8x128xf32>
      %155 = arith.addf %153, %154 : vector<8x128xf32>
      %156 = math.tanh %155 : vector<8x128xf32>
      %157 = arith.mulf %150, %156 : vector<8x128xf32>
      %158 = vector.broadcast %95 : i32 to vector<8x1xi32>
      %159 = arith.cmpi sgt, %1, %158 : vector<8x1xi32>
      %160 = vector.shape_cast %159 : vector<8x1xi1> to vector<8x1xi1>
      %161 = vector.broadcast %160 : vector<8x1xi1> to vector<8x128xi1>
      %162 = arith.select %161, %157, %81 : vector<8x128xi1>, vector<8x128xf32>
      %163 = vector.shape_cast %159 : vector<8x1xi1> to vector<8x1xi1>
      %164 = vector.broadcast %163 : vector<8x1xi1> to vector<8x128xi1>
      %165 = arith.select %164, %155, %84 : vector<8x128xi1>, vector<8x128xf32>
      %cst_46 = arith.constant 0.000000e+00 : f32
      %166 = vector.shape_cast %159 : vector<8x1xi1> to vector<8x1xi1>
      %167 = vector.broadcast %166 : vector<8x1xi1> to vector<8x128xi1>
      %168 = vector.broadcast %cst_46 : f32 to vector<8x128xf32>
      %169 = arith.select %167, %157, %168 : vector<8x128xi1>, vector<8x128xf32>
      %c0_47 = arith.constant 0 : index
      %170 = arith.index_cast %99 : i32 to index
      %c128_48 = arith.constant 128 : index
      %171 = vector.load %arg7[%c0_47, %170, %c128_48] : memref<1x64x256xf32, #tpu.memory_space<vmem>>, vector<1x8x128xf32>
      %172 = vector.shape_cast %171 : vector<1x8x128xf32> to vector<8x128xf32>
      %173 = vector.shape_cast %169 : vector<8x128xf32> to vector<1x8x128xf32>
      tpu.vector_store %arg7[%c0_47, %170, %c128_48], %173 {strides = array<i32>} : memref<1x64x256xf32, #tpu.memory_space<vmem>>, vector<1x8x128xf32>,
      scf.yield %125, %128, %162, %165 : vector<8x128xf32>, vector<8x128xf32>, vector<8x128xf32>, vector<8x128xf32>
    }
    %c4_i32_12 = arith.constant 4 : i32
    return
  }
  func.func @transform_0(%arg0: i32) -> (i32, i32, i32) {
    %c0_i32 = arith.constant 0 : i32
    %c0_i32_0 = arith.constant 0 : i32
    %c0_i32_1 = arith.constant 0 : i32
    return %arg0, %c0_i32, %c0_i32_0 : i32, i32, i32
  }
  func.func @transform_1(%arg0: i32) -> (i32, i32, i32) {
    %c0_i32 = arith.constant 0 : i32
    %c0_i32_0 = arith.constant 0 : i32
    %c0_i32_1 = arith.constant 0 : i32
    return %arg0, %c0_i32, %c0_i32_0 : i32, i32, i32
  }
  func.func @transform_2(%arg0: i32) -> (i32, i32) {
    %c0_i32 = arith.constant 0 : i32
    %c0_i32_0 = arith.constant 0 : i32
    %c0_i32_1 = arith.constant 0 : i32
    return %c0_i32, %c0_i32_0 : i32, i32
  }
  func.func @transform_3(%arg0: i32) -> (i32, i32) {
    %c0_i32 = arith.constant 0 : i32
    %c0_i32_0 = arith.constant 0 : i32
    %c0_i32_1 = arith.constant 0 : i32
    return %c0_i32, %c0_i32_0 : i32, i32
  }
  func.func @transform_4(%arg0: i32) -> (i32, i32) {
    %c0_i32 = arith.constant 0 : i32
    %c0_i32_0 = arith.constant 0 : i32
    %c0_i32_1 = arith.constant 0 : i32
    return %c0_i32, %c0_i32_0 : i32, i32
  }
  func.func @transform_5(%arg0: i32) -> (i32, i32) {
    %c0_i32 = arith.constant 0 : i32
    %c0_i32_0 = arith.constant 0 : i32
    %c0_i32_1 = arith.constant 0 : i32
    return %c0_i32, %c0_i32_0 : i32, i32
  }
  func.func @transform_6(%arg0: i32) -> (i32, i32, i32) {
    %c0_i32 = arith.constant 0 : i32
    %c0_i32_0 = arith.constant 0 : i32
    %c0_i32_1 = arith.constant 0 : i32
    return %arg0, %c0_i32, %c0_i32_0 : i32, i32, i32
  }
}

</mosaic_0001>

<bundles_post_ra>
// kernel: tpu_custom_call.1
= control target key start
LH: loop header
LB: loop body
LE: loop exit
PB: predicated region body
PF: predicated region fallthrough
CT: control target
= control target key end

     0   :  { %11 = vsyncpa [#allocation4], 0  ;;  %s3082_s0 = inlined_call_operand.hbm [shape: f32[1,64,128], index: 0, kind: input, shape index: {}]   ;;  %s3083_s1 = inlined_call_operand.vmem [shape: s32[1,8,1], index: 1, kind: input, shape index: {}]   ;;  %s3084_s2 = inlined_call_operand.hbm [shape: f32[128,1024], index: 2, kind: input, shape index: {}]   ;;  %s3085_s3 = inlined_call_operand.vmem [shape: f32[1,1024], index: 3, kind: input, shape index: {}]   ;;  %s3086_s4 = inlined_call_operand.hbm [shape: f32[128,512], index: 4, kind: input, shape index: {}]   ;;  %s3087_s5 = inlined_call_operand.hbm [shape: f32[128,512], index: 5, kind: input, shape index: {}]   ;;  %s3088_s6 = inlined_call_operand.hbm [shape: f32[1,64,256], index: 6, kind: output, shape index: {}]  }
   0x1   :  { %12 = vsyncpa [#allocation7], 0 }
   0x2   :  { %13 = vsyncpa [#allocation10], 0 }
   0x3   :  { %14 = vsyncpa [#allocation5], 0  ;;  %s2186_s21 = smov [#allocation6]  }
   0x4   :  { %s34_s22 = sshll.u32 %s2186_s21, 4  ;;  %s35_s22 = int_to_ptr.vmem [resolvable:$true] %s34_s22 }
   0x5   :  { %s2046_s23 = scalar_lea.vmem %s35_s22, 16384  ;;  %p2051_p1 = scmp.lt.s32.totalorder %s35_s22, %s35_s22 }
   0x6   :  { %p2047_p0 = scmp.ne.s32.totalorder %s35_s22, %s2046_s23  ;;  %p2052_p2 = scmp.lt.s32.totalorder %s2046_s23, %s2046_s23 }
   0x8   :  { %p2053_p3 = por %p2052_p2, %p2051_p1 }
   0xa   :  { %p2054_p4 = pnand %p2053_p3, %p2047_p0 }
   0xc   :  { %2057 = shalt.err (!%p2054_p4)
}
   0xd   :  { %s2187_s24 = smov 1024   ;;  %s2188_s25 = smov 64  }
   0xe   :  { %40 = dma.hbm_to_vmem [thread:$0]  %s3084_s2, 16384, %s35_s22, [#allocation7], %s2187_s24, %s2187_s24, %s2188_s25  }
   0xf   :  { %s2189_s28 = smov [#allocation3]  }
  0x10   :  { %s20_s29 = sshll.u32 %s2189_s28, 4  ;;  %s21_s29 = int_to_ptr.vmem [resolvable:$true] %s20_s29 }
  0x11   :  { %s2066_s30 = scalar_lea.vmem %s21_s29, 1024  ;;  %p2071_p6 = scmp.lt.s32.totalorder %s21_s29, %s21_s29 }
  0x12   :  { %p2067_p5 = scmp.ne.s32.totalorder %s21_s29, %s2066_s30  ;;  %p2072_p7 = scmp.lt.s32.totalorder %s2066_s30, %s2066_s30 }
  0x14   :  { %p2073_p8 = por %p2072_p7, %p2071_p6 }
  0x16   :  { %p2074_p9 = pnand %p2073_p8, %p2067_p5 }
  0x18   :  { %2077 = shalt.err (!%p2074_p9)
}
  0x19   :  { %s2190_s7 = smov 128   ;;  %s2191_s8 = smov 8  }
  0x1a   :  { %26 = dma.hbm_to_vmem [thread:$0]  %s3082_s0, 1024, %s21_s29, [#allocation4], %s2190_s7, %s2190_s7, %s2191_s8  }
  0x1b   :  { %s2192_s11 = smov [#allocation8]  }
  0x1c   :  { %s48_s12 = sshll.u32 %s2192_s11, 4  ;;  %s49_s12 = int_to_ptr.vmem [resolvable:$true] %s48_s12 }
  0x1d   :  { %s2086_s2 = scalar_lea.vmem %s49_s12, 8192  ;;  %p2091_p11 = scmp.lt.s32.totalorder %s49_s12, %s49_s12 }
  0x1e   :  { %p2087_p10 = scmp.ne.s32.totalorder %s49_s12, %s2086_s2  ;;  %p2092_p12 = scmp.lt.s32.totalorder %s2086_s2, %s2086_s2 }
  0x20   :  { %p2093_p13 = por %p2092_p12, %p2091_p11 }
  0x22   :  { %p2094_p0 = pnand %p2093_p13, %p2087_p10 }
  0x24   :  { %2097 = shalt.err (!%p2094_p0)
}
  0x25   :  { %s2193_s13 = smov 512   ;;  %s2194_s14 = smov 32  }
  0x26   :  { %54 = dma.hbm_to_vmem [thread:$0]  %s3086_s4, 8192, %s49_s12, [#allocation7], %s2193_s13, %s2193_s13, %s2194_s14  }
  0x27   :  { %s2195_s17 = smov [#allocation9]  }
  0x28   :  { %s60_s18 = sshll.u32 %s2195_s17, 4  ;;  %s61_s18 = int_to_ptr.vmem [resolvable:$true] %s60_s18 }
  0x29   :  { %s2106_s0 = scalar_lea.vmem %s61_s18, 8192  ;;  %p2111_p2 = scmp.lt.s32.totalorder %s61_s18, %s61_s18 }
  0x2a   :  { %p2107_p1 = scmp.ne.s32.totalorder %s61_s18, %s2106_s0  ;;  %p2112_p3 = scmp.lt.s32.totalorder %s2106_s0, %s2106_s0 }
  0x2c   :  { %p2113_p4 = por %p2112_p3, %p2111_p2 }
  0x2e   :  { %p2114_p5 = pnand %p2113_p4, %p2107_p1 }
  0x30   :  { %2117 = shalt.err (!%p2114_p5)
}
  0x31   :  { %66 = dma.hbm_to_vmem [thread:$0]  %s3087_s5, 8192, %s61_s18, [#allocation10], %s2193_s13, %s2193_s13, %s2194_s14  }
  0x32   :  { %2158 = dma.done.wait [#allocation4], 1024  }
  0x33   :  { %2159 = vsyncadd [#allocation4], 4294966272 }
  0x34   :  { %2160 = dma.done.wait [#allocation7], 24576  }
  0x35   :  { %2161 = vsyncadd [#allocation7], 4294942720 }
  0x36   :  { %2162 = dma.done.wait [#allocation10], 8192  }
  0x37   :  { %2163 = vsyncadd [#allocation10], 4294959104  ;;  %v2196_v0 = vmov 0.0   ;;  %v2254_v1 = vld [vmem:[%s3083_s1] sm:$0xff]  ;;  %v209_v2 = vld [vmem:[#allocation6 + $0x3c8] sm:$0xff] }
  0x38   :  { %322 = vmatprep.mubr.f32.mxu0 %v2196_v0  ;;  %435 = vmatprep.mubr.f32.mxu1 %v2196_v0  ;;  %v211_v3 = vld [vmem:[#allocation6 + $0x3d8] sm:$0xff]  ;;  %v208_v4 = vld [vmem:[#allocation6 + $0x3c0] sm:$0xff]  ;;  %v210_v5 = vld [vmem:[#allocation6 + $0x3d0] sm:$0xff] }
  0x39   :  { %258 = vmatprep.subr.mxu0 %v209_v2  ;;  %371 = vmatprep.subr.mxu1 %v211_v3  ;;  %v201_v6 = vld [vmem:[#allocation6 + $0x388] sm:$0xff]  ;;  %v203_v7 = vld [vmem:[#allocation6 + $0x398] sm:$0xff]  ;;  %v200_v8 = vld [vmem:[#allocation6 + $0x380] sm:$0xff] }
  0x3a   :  { %259 = vmatpush1.msra.mxu0 %v208_v4  ;;  %372 = vmatpush1.msra.mxu1 %v210_v5  ;;  %v202_v9 = vld [vmem:[#allocation6 + $0x390] sm:$0xff]  ;;  %v193_v10 = vld [vmem:[#allocation6 + $0x348] sm:$0xff]  ;;  %v195_v11 = vld [vmem:[#allocation6 + $0x358] sm:$0xff] }
  0x3b   :  { %260 = vmatprep.subr.mxu0 %v201_v6  ;;  %373 = vmatprep.subr.mxu1 %v203_v7  ;;  %v192_v12 = vld [vmem:[#allocation6 + $0x340] sm:$0xff]  ;;  %v194_v13 = vld [vmem:[#allocation6 + $0x350] sm:$0xff]  ;;  %v185_v14 = vld [vmem:[#allocation6 + $0x308] sm:$0xff] }
  0x3c   :  { %261 = vmatpush1.msra.mxu0 %v200_v8  ;;  %374 = vmatpush1.msra.mxu1 %v202_v9  ;;  %v187_v15 = vld [vmem:[#allocation6 + $0x318] sm:$0xff]  ;;  %v184_v16 = vld [vmem:[#allocation6 + $0x300] sm:$0xff]  ;;  %v186_v17 = vld [vmem:[#allocation6 + $0x310] sm:$0xff] }
  0x3d   :  { %262 = vmatprep.subr.mxu0 %v193_v10  ;;  %375 = vmatprep.subr.mxu1 %v195_v11  ;;  %v177_v18 = vld [vmem:[#allocation6 + $0x2c8] sm:$0xff]  ;;  %v179_v19 = vld [vmem:[#allocation6 + $0x2d8] sm:$0xff]  ;;  %v176_v20 = vld [vmem:[#allocation6 + $0x2c0] sm:$0xff] }
  0x3e   :  { %263 = vmatpush1.msra.mxu0 %v192_v12  ;;  %376 = vmatpush1.msra.mxu1 %v194_v13  ;;  %v178_v21 = vld [vmem:[#allocation6 + $0x2d0] sm:$0xff]  ;;  %v169_v22 = vld [vmem:[#allocation6 + $0x288] sm:$0xff]  ;;  %v171_v23 = vld [vmem:[#allocation6 + $0x298] sm:$0xff] }
  0x3f   :  { %264 = vmatprep.subr.mxu0 %v185_v14  ;;  %377 = vmatprep.subr.mxu1 %v187_v15  ;;  %v168_v24 = vld [vmem:[#allocation6 + $0x280] sm:$0xff]  ;;  %v170_v25 = vld [vmem:[#allocation6 + $0x290] sm:$0xff]  ;;  %v161_v26 = vld [vmem:[#allocation6 + $0x248] sm:$0xff] }
  0x40   :  { %265 = vmatpush1.msra.mxu0 %v184_v16  ;;  %378 = vmatpush1.msra.mxu1 %v186_v17  ;;  %v163_v27 = vld [vmem:[#allocation6 + $0x258] sm:$0xff]  ;;  %v160_v28 = vld [vmem:[#allocation6 + $0x240] sm:$0xff]  ;;  %v162_v29 = vld [vmem:[#allocation6 + $0x250] sm:$0xff] }
  0x41   :  { %266 = vmatprep.subr.mxu0 %v177_v18  ;;  %379 = vmatprep.subr.mxu1 %v179_v19  ;;  %v153_v30 = vld [vmem:[#allocation6 + $0x208] sm:$0xff]  ;;  %v155_v31 = vld [vmem:[#allocation6 + $0x218] sm:$0xff]  ;;  %v152_v32 = vld [vmem:[#allocation6 + $0x200] sm:$0xff] }
  0x42   :  { %267 = vmatpush1.msra.mxu0 %v176_v20  ;;  %380 = vmatpush1.msra.mxu1 %v178_v21  ;;  %v154_v33 = vld [vmem:[#allocation6 + $0x210] sm:$0xff]  ;;  %v145_v34 = vld [vmem:[#allocation6 + $0x1c8] sm:$0xff]  ;;  %v147_v35 = vld [vmem:[#allocation6 + $0x1d8] sm:$0xff] }
  0x43   :  { %268 = vmatprep.subr.mxu0 %v169_v22  ;;  %381 = vmatprep.subr.mxu1 %v171_v23  ;;  %v144_v36 = vld [vmem:[#allocation6 + $0x1c0] sm:$0xff]  ;;  %v146_v37 = vld [vmem:[#allocation6 + $0x1d0] sm:$0xff]  ;;  %v137_v38 = vld [vmem:[#allocation6 + $0x188] sm:$0xff] }
  0x44   :  { %269 = vmatpush1.msra.mxu0 %v168_v24  ;;  %382 = vmatpush1.msra.mxu1 %v170_v25  ;;  %v139_v39 = vld [vmem:[#allocation6 + $0x198] sm:$0xff]  ;;  %v136_v40 = vld [vmem:[#allocation6 + $0x180] sm:$0xff]  ;;  %v138_v41 = vld [vmem:[#allocation6 + $0x190] sm:$0xff] }
  0x45   :  { %270 = vmatprep.subr.mxu0 %v161_v26  ;;  %383 = vmatprep.subr.mxu1 %v163_v27  ;;  %v129_v42 = vld [vmem:[#allocation6 + $0x148] sm:$0xff]  ;;  %v131_v43 = vld [vmem:[#allocation6 + $0x158] sm:$0xff]  ;;  %v128_v44 = vld [vmem:[#allocation6 + $0x140] sm:$0xff] }
  0x46   :  { %271 = vmatpush1.msra.mxu0 %v160_v28  ;;  %384 = vmatpush1.msra.mxu1 %v162_v29  ;;  %v130_v45 = vld [vmem:[#allocation6 + $0x150] sm:$0xff]  ;;  %v121_v46 = vld [vmem:[#allocation6 + $0x108] sm:$0xff]  ;;  %v123_v47 = vld [vmem:[#allocation6 + $0x118] sm:$0xff] }
  0x47   :  { %272 = vmatprep.subr.mxu0 %v153_v30  ;;  %385 = vmatprep.subr.mxu1 %v155_v31  ;;  %v120_v48 = vld [vmem:[#allocation6 + $0x100] sm:$0xff]  ;;  %v122_v49 = vld [vmem:[#allocation6 + $0x110] sm:$0xff]  ;;  %v113_v50 = vld [vmem:[#allocation6 + $0xc8] sm:$0xff] }
  0x48   :  { %273 = vmatpush1.msra.mxu0 %v152_v32  ;;  %386 = vmatpush1.msra.mxu1 %v154_v33  ;;  %v115_v51 = vld [vmem:[#allocation6 + $0xd8] sm:$0xff]  ;;  %v112_v52 = vld [vmem:[#allocation6 + $0xc0] sm:$0xff]  ;;  %v114_v53 = vld [vmem:[#allocation6 + $0xd0] sm:$0xff] }
  0x49   :  { %274 = vmatprep.subr.mxu0 %v145_v34  ;;  %387 = vmatprep.subr.mxu1 %v147_v35  ;;  %v105_v54 = vld [vmem:[#allocation6 + $0x88] sm:$0xff]  ;;  %v107_v55 = vld [vmem:[#allocation6 + $0x98] sm:$0xff]  ;;  %v104_v56 = vld [vmem:[#allocation6 + $0x80] sm:$0xff] }
  0x4a   :  { %275 = vmatpush1.msra.mxu0 %v144_v36  ;;  %388 = vmatpush1.msra.mxu1 %v146_v37  ;;  %v106_v57 = vld [vmem:[#allocation6 + $0x90] sm:$0xff]  ;;  %v97_v58 = vld [vmem:[#allocation6 + $0x48] sm:$0xff]  ;;  %v99_v59 = vld [vmem:[#allocation6 + $0x58] sm:$0xff] }
  0x4b   :  { %276 = vmatprep.subr.mxu0 %v137_v38  ;;  %389 = vmatprep.subr.mxu1 %v139_v39  ;;  %v96_v60 = vld [vmem:[#allocation6 + $0x40] sm:$0xff]  ;;  %v98_v61 = vld [vmem:[#allocation6 + $0x50] sm:$0xff]  ;;  %v89_v62 = vld [vmem:[#allocation6 + $0x8] sm:$0xff] }
  0x4c   :  { %277 = vmatpush1.msra.mxu0 %v136_v40  ;;  %390 = vmatpush1.msra.mxu1 %v138_v41  ;;  %v91_v63 = vld [vmem:[#allocation6 + $0x18] sm:$0xff]  ;;  %v88_v2 = vld [vmem:[#allocation6] sm:$0xff]  ;;  %v90_v3 = vld [vmem:[#allocation6 + $0x10] sm:$0xff] }
  0x4d   :  { %278 = vmatprep.subr.mxu0 %v129_v42  ;;  %391 = vmatprep.subr.mxu1 %v131_v43  ;;  %v2256_v4 = vld [vmem:[#allocation3] sm:$0xff]  ;;  %v213_v5 = vld [vmem:[#allocation6 + $0x3e8] sm:$0xff]  ;;  %v215_v6 = vld [vmem:[#allocation6 + $0x3f8] sm:$0xff] }
  0x4e   :  { %279 = vmatpush1.msra.mxu0 %v128_v44  ;;  %392 = vmatpush1.msra.mxu1 %v130_v45  ;;  %v212_v7 = vld [vmem:[#allocation6 + $0x3e0] sm:$0xff]  ;;  %v214_v8 = vld [vmem:[#allocation6 + $0x3f0] sm:$0xff]  ;;  %v205_v9 = vld [vmem:[#allocation6 + $0x3a8] sm:$0xff] }
  0x4f   :  { %280 = vmatprep.subr.mxu0 %v121_v46  ;;  %393 = vmatprep.subr.mxu1 %v123_v47  ;;  %v207_v10 = vld [vmem:[#allocation6 + $0x3b8] sm:$0xff]  ;;  %v204_v11 = vld [vmem:[#allocation6 + $0x3a0] sm:$0xff]  ;;  %v206_v12 = vld [vmem:[#allocation6 + $0x3b0] sm:$0xff] }
  0x50   :  { %281 = vmatpush1.msra.mxu0 %v120_v48  ;;  %394 = vmatpush1.msra.mxu1 %v122_v49  ;;  %v2260_v13 = vld [vmem:[#allocation3 + $0x8] sm:$0xff]  ;;  %v199_v15 = vld [vmem:[#allocation6 + $0x378] sm:$0xff]  ;;  %v196_v16 = vld [vmem:[#allocation6 + $0x360] sm:$0xff] }
  0x51   :  { %282 = vmatprep.subr.mxu0 %v113_v50  ;;  %395 = vmatprep.subr.mxu1 %v115_v51  ;;  %v197_v14 = vld [vmem:[#allocation6 + $0x368] sm:$0xff]  ;;  %v198_v17 = vld [vmem:[#allocation6 + $0x370] sm:$0xff]  ;;  %v191_v19 = vld [vmem:[#allocation6 + $0x338] sm:$0xff] }
  0x52   :  { %283 = vmatpush1.msra.mxu0 %v112_v52  ;;  %396 = vmatpush1.msra.mxu1 %v114_v53  ;;  %v189_v18 = vld [vmem:[#allocation6 + $0x328] sm:$0xff]  ;;  %v188_v20 = vld [vmem:[#allocation6 + $0x320] sm:$0xff]  ;;  %v190_v21 = vld [vmem:[#allocation6 + $0x330] sm:$0xff] }
  0x53   :  { %284 = vmatprep.subr.mxu0 %v105_v54  ;;  %397 = vmatprep.subr.mxu1 %v107_v55  ;;  %v2266_v22 = vld [vmem:[#allocation3 + $0x10] sm:$0xff]  ;;  %v181_v23 = vld [vmem:[#allocation6 + $0x2e8] sm:$0xff]  ;;  %v183_v24 = vld [vmem:[#allocation6 + $0x2f8] sm:$0xff] }
  0x54   :  { %285 = vmatpush1.msra.mxu0 %v104_v56  ;;  %398 = vmatpush1.msra.mxu1 %v106_v57  ;;  %v180_v25 = vld [vmem:[#allocation6 + $0x2e0] sm:$0xff]  ;;  %v182_v26 = vld [vmem:[#allocation6 + $0x2f0] sm:$0xff]  ;;  %v173_v27 = vld [vmem:[#allocation6 + $0x2a8] sm:$0xff] }
  0x55   :  { %286 = vmatprep.subr.mxu0 %v97_v58  ;;  %399 = vmatprep.subr.mxu1 %v99_v59  ;;  %v175_v28 = vld [vmem:[#allocation6 + $0x2b8] sm:$0xff]  ;;  %v172_v29 = vld [vmem:[#allocation6 + $0x2a0] sm:$0xff]  ;;  %v174_v30 = vld [vmem:[#allocation6 + $0x2b0] sm:$0xff] }
  0x56   :  { %287 = vmatpush1.msra.mxu0 %v96_v60  ;;  %400 = vmatpush1.msra.mxu1 %v98_v61  ;;  %v2272_v31 = vld [vmem:[#allocation3 + $0x18] sm:$0xff]  ;;  %v165_v32 = vld [vmem:[#allocation6 + $0x268] sm:$0xff]  ;;  %v164_v34 = vld [vmem:[#allocation6 + $0x260] sm:$0xff] }
  0x57   :  { %288 = vmatprep.subr.mxu0 %v89_v62  ;;  %401 = vmatprep.subr.mxu1 %v91_v63  ;;  %v167_v33 = vld [vmem:[#allocation6 + $0x278] sm:$0xff]  ;;  %v166_v35 = vld [vmem:[#allocation6 + $0x270] sm:$0xff]  ;;  %v157_v36 = vld [vmem:[#allocation6 + $0x228] sm:$0xff] }
  0x58   :  { %289 = vmatpush1.msra.mxu0 %v88_v2  ;;  %402 = vmatpush1.msra.mxu1 %v90_v3  ;;  %v159_v37 = vld [vmem:[#allocation6 + $0x238] sm:$0xff]  ;;  %v156_v38 = vld [vmem:[#allocation6 + $0x220] sm:$0xff]  ;;  %v158_v39 = vld [vmem:[#allocation6 + $0x230] sm:$0xff] }
  0x59   :  { %323 = vmatmul.mubr.f32.vlgmr.msra.gmra.mxu0 %v2256_v4  ;;  %436 = vmatmul.mubr.f32.vlgmr.msra.gmra.mxu1 %v2256_v4  ;;  %v2278_v40 = vld [vmem:[#allocation3 + $0x20] sm:$0xff]  ;;  %v149_v41 = vld [vmem:[#allocation6 + $0x1e8] sm:$0xff]  ;;  %v151_v42 = vld [vmem:[#allocation6 + $0x1f8] sm:$0xff] }
  0x5a   :  { %484 = vmatprep.subr.mxu0 %v213_v5  ;;  %597 = vmatprep.subr.mxu1 %v215_v6  ;;  %v148_v43 = vld [vmem:[#allocation6 + $0x1e0] sm:$0xff]  ;;  %v150_v44 = vld [vmem:[#allocation6 + $0x1f0] sm:$0xff]  ;;  %v141_v45 = vld [vmem:[#allocation6 + $0x1a8] sm:$0xff] }
  0x5b   :  { %485 = vmatpush1.msra.mxu0 %v212_v7  ;;  %598 = vmatpush1.msra.mxu1 %v214_v8  ;;  %v143_v46 = vld [vmem:[#allocation6 + $0x1b8] sm:$0xff]  ;;  %v140_v47 = vld [vmem:[#allocation6 + $0x1a0] sm:$0xff]  ;;  %v142_v48 = vld [vmem:[#allocation6 + $0x1b0] sm:$0xff] }
  0x5c   :  { %486 = vmatprep.subr.mxu0 %v205_v9  ;;  %599 = vmatprep.subr.mxu1 %v207_v10  ;;  %v2284_v49 = vld [vmem:[#allocation3 + $0x28] sm:$0xff]  ;;  %v135_v51 = vld [vmem:[#allocation6 + $0x178] sm:$0xff]  ;;  %v132_v52 = vld [vmem:[#allocation6 + $0x160] sm:$0xff] }
  0x5d   :  { %328 = vmatprep.mubr.f32.mxu0 %v2196_v0  ;;  %441 = vmatprep.mubr.f32.mxu1 %v2196_v0  ;;  %v133_v50 = vld [vmem:[#allocation6 + $0x168] sm:$0xff]  ;;  %v134_v53 = vld [vmem:[#allocation6 + $0x170] sm:$0xff]  ;;  %v127_v55 = vld [vmem:[#allocation6 + $0x138] sm:$0xff] }
  0x5e   :  { %487 = vmatpush1.msra.mxu0 %v204_v11  ;;  %600 = vmatpush1.msra.mxu1 %v206_v12  ;;  %v125_v54 = vld [vmem:[#allocation6 + $0x128] sm:$0xff]  ;;  %v124_v56 = vld [vmem:[#allocation6 + $0x120] sm:$0xff]  ;;  %v126_v57 = vld [vmem:[#allocation6 + $0x130] sm:$0xff] }
  0x5f   :  { %329 = vmatmul.mubr.f32.gmra.mxu0 %v2260_v13  ;;  %442 = vmatmul.mubr.f32.gmra.mxu1 %v2260_v13  ;;  %v2290_v58 = vld [vmem:[#allocation3 + $0x30] sm:$0xff]  ;;  %v117_v59 = vld [vmem:[#allocation6 + $0xe8] sm:$0xff]  ;;  %v119_v60 = vld [vmem:[#allocation6 + $0xf8] sm:$0xff] }
  0x60   :  { %488 = vmatprep.subr.mxu0 %v197_v14  ;;  %601 = vmatprep.subr.mxu1 %v199_v15  ;;  %v116_v61 = vld [vmem:[#allocation6 + $0xe0] sm:$0xff]  ;;  %v118_v62 = vld [vmem:[#allocation6 + $0xf0] sm:$0xff]  ;;  %v109_v63 = vld [vmem:[#allocation6 + $0xa8] sm:$0xff] }
  0x61   :  { %489 = vmatpush1.msra.mxu0 %v196_v16  ;;  %602 = vmatpush1.msra.mxu1 %v198_v17  ;;  %v111_v2 = vld [vmem:[#allocation6 + $0xb8] sm:$0xff]  ;;  %v108_v3 = vld [vmem:[#allocation6 + $0xa0] sm:$0xff]  ;;  %v110_v5 = vld [vmem:[#allocation6 + $0xb0] sm:$0xff] }
  0x62   :  { %490 = vmatprep.subr.mxu0 %v189_v18  ;;  %603 = vmatprep.subr.mxu1 %v191_v19  ;;  %v87_v6 = vld [vmem:[#allocation3 + $0x38] sm:$0xff]  ;;  %v101_v7 = vld [vmem:[#allocation6 + $0x68] sm:$0xff]  ;;  %v100_v9 = vld [vmem:[#allocation6 + $0x60] sm:$0xff] }
  0x63   :  { %334 = vmatprep.mubr.f32.mxu0 %v2196_v0  ;;  %447 = vmatprep.mubr.f32.mxu1 %v2196_v0  ;;  %v103_v8 = vld [vmem:[#allocation6 + $0x78] sm:$0xff]  ;;  %v102_v10 = vld [vmem:[#allocation6 + $0x70] sm:$0xff]  ;;  %v93_v11 = vld [vmem:[#allocation6 + $0x28] sm:$0xff] }
  0x64   :  { %491 = vmatpush1.msra.mxu0 %v188_v20  ;;  %604 = vmatpush1.msra.mxu1 %v190_v21  ;;  %v95_v12 = vld [vmem:[#allocation6 + $0x38] sm:$0xff]  ;;  %v92_v14 = vld [vmem:[#allocation6 + $0x20] sm:$0xff]  ;;  %v94_v15 = vld [vmem:[#allocation6 + $0x30] sm:$0xff] }
  0x65   :  { %335 = vmatmul.mubr.f32.gmra.mxu0 %v2266_v22  ;;  %448 = vmatmul.mubr.f32.gmra.mxu1 %v2266_v22  ;;  %v2335_v18 = vld [vmem:[%s3085_s3] sm:$0xff]  ;;  %s2439_s3 = smov 0  }
  0x66   :  { %492 = vmatprep.subr.mxu0 %v181_v23  ;;  %605 = vmatprep.subr.mxu1 %v183_v24 }
  0x67   :  { %493 = vmatpush1.msra.mxu0 %v180_v25  ;;  %606 = vmatpush1.msra.mxu1 %v182_v26 }
  0x68   :  { %494 = vmatprep.subr.mxu0 %v173_v27  ;;  %607 = vmatprep.subr.mxu1 %v175_v28 }
  0x69   :  { %340 = vmatprep.mubr.f32.mxu0 %v2196_v0  ;;  %453 = vmatprep.mubr.f32.mxu1 %v2196_v0 }
  0x6a   :  { %495 = vmatpush1.msra.mxu0 %v172_v29  ;;  %608 = vmatpush1.msra.mxu1 %v174_v30 }
  0x6b   :  { %341 = vmatmul.mubr.f32.gmra.mxu0 %v2272_v31  ;;  %454 = vmatmul.mubr.f32.gmra.mxu1 %v2272_v31 }
  0x6c   :  { %496 = vmatprep.subr.mxu0 %v165_v32  ;;  %609 = vmatprep.subr.mxu1 %v167_v33 }
  0x6d   :  { %497 = vmatpush1.msra.mxu0 %v164_v34  ;;  %610 = vmatpush1.msra.mxu1 %v166_v35 }
  0x6e   :  { %498 = vmatprep.subr.mxu0 %v157_v36  ;;  %611 = vmatprep.subr.mxu1 %v159_v37 }
  0x6f   :  { %346 = vmatprep.mubr.f32.mxu0 %v2196_v0  ;;  %459 = vmatprep.mubr.f32.mxu1 %v2196_v0 }
  0x70   :  { %499 = vmatpush1.msra.mxu0 %v156_v38  ;;  %612 = vmatpush1.msra.mxu1 %v158_v39 }
  0x71   :  { %347 = vmatmul.mubr.f32.gmra.mxu0 %v2278_v40  ;;  %460 = vmatmul.mubr.f32.gmra.mxu1 %v2278_v40 }
  0x72   :  { %500 = vmatprep.subr.mxu0 %v149_v41  ;;  %613 = vmatprep.subr.mxu1 %v151_v42 }
  0x73   :  { %501 = vmatpush1.msra.mxu0 %v148_v43  ;;  %614 = vmatpush1.msra.mxu1 %v150_v44 }
  0x74   :  { %502 = vmatprep.subr.mxu0 %v141_v45  ;;  %615 = vmatprep.subr.mxu1 %v143_v46 }
  0x75   :  { %352 = vmatprep.mubr.f32.mxu0 %v2196_v0  ;;  %465 = vmatprep.mubr.f32.mxu1 %v2196_v0 }
  0x76   :  { %503 = vmatpush1.msra.mxu0 %v140_v47  ;;  %616 = vmatpush1.msra.mxu1 %v142_v48 }
  0x77   :  { %353 = vmatmul.mubr.f32.gmra.mxu0 %v2284_v49  ;;  %466 = vmatmul.mubr.f32.gmra.mxu1 %v2284_v49 }
  0x78   :  { %504 = vmatprep.subr.mxu0 %v133_v50  ;;  %617 = vmatprep.subr.mxu1 %v135_v51 }
  0x79   :  { %505 = vmatpush1.msra.mxu0 %v132_v52  ;;  %618 = vmatpush1.msra.mxu1 %v134_v53 }
  0x7a   :  { %506 = vmatprep.subr.mxu0 %v125_v54  ;;  %619 = vmatprep.subr.mxu1 %v127_v55 }
  0x7b   :  { %358 = vmatprep.mubr.f32.mxu0 %v2196_v0  ;;  %471 = vmatprep.mubr.f32.mxu1 %v2196_v0 }
  0x7c   :  { %507 = vmatpush1.msra.mxu0 %v124_v56  ;;  %620 = vmatpush1.msra.mxu1 %v126_v57 }
  0x7d   :  { %359 = vmatmul.mubr.f32.gmra.mxu0 %v2290_v58  ;;  %472 = vmatmul.mubr.f32.gmra.mxu1 %v2290_v58 }
  0x7e   :  { %508 = vmatprep.subr.mxu0 %v117_v59  ;;  %621 = vmatprep.subr.mxu1 %v119_v60 }
  0x7f   :  { %509 = vmatpush1.msra.mxu0 %v116_v61  ;;  %622 = vmatpush1.msra.mxu1 %v118_v62 }
  0x80   :  { %510 = vmatprep.subr.mxu0 %v109_v63  ;;  %623 = vmatprep.subr.mxu1 %v111_v2 }
  0x81   :  { %364 = vmatprep.mubr.f32.mxu0 %v2196_v0  ;;  %477 = vmatprep.mubr.f32.mxu1 %v2196_v0 }
  0x82   :  { %511 = vmatpush1.msra.mxu0 %v108_v3  ;;  %624 = vmatpush1.msra.mxu1 %v110_v5 }
  0x83   :  { %365 = vmatmul.mubr.f32.gmra.mxu0 %v87_v6  ;;  %478 = vmatmul.mubr.f32.gmra.mxu1 %v87_v6 }
  0x84   :  { %512 = vmatprep.subr.mxu0 %v101_v7  ;;  %625 = vmatprep.subr.mxu1 %v103_v8 }
  0x85   :  { %513 = vmatpush1.msra.mxu0 %v100_v9  ;;  %626 = vmatpush1.msra.mxu1 %v102_v10 }
  0x86   :  { %514 = vmatprep.subr.mxu0 %v93_v11  ;;  %627 = vmatprep.subr.mxu1 %v95_v12 }
  0x87   :  { %515 = vmatpush1.msra.mxu0 %v92_v14  ;;  %548 = vmatprep.mubr.f32.mxu0 %v2196_v0 }
  0x88   :  { %628 = vmatpush1.msra.mxu1 %v94_v15  ;;  %661 = vmatprep.mubr.f32.mxu1 %v2196_v0 }
  0x89   :  { %549 = vmatmul.mubr.f32.vlgmr.msra.gmra.mxu0 %v2256_v4  ;;  %662 = vmatmul.mubr.f32.vlgmr.msra.gmra.mxu1 %v2256_v4  ;;  %v218_v4 = vlaneseq }
  0x8a   :  { %554 = vmatprep.mubr.f32.mxu0 %v2196_v0  ;;  %667 = vmatprep.mubr.f32.mxu1 %v2196_v0 }
  0x8d   :  { %555 = vmatmul.mubr.f32.gmra.mxu0 %v2260_v13  ;;  %668 = vmatmul.mubr.f32.gmra.mxu1 %v2260_v13  ;;  %v2328_v13 = vshrl.u32 %v218_v4, 7 }
  0x8e   :  { %560 = vmatprep.mubr.f32.mxu0 %v2196_v0  ;;  %673 = vmatprep.mubr.f32.mxu1 %v2196_v0 }
  0x8f   :  { %v220_v16 = vsub.s32 0, %v2328_v13  ;;  %v228_v17 = vsub.s32 2, %v2328_v13  ;;  %v224_v19 = vsub.s32 1, %v2328_v13  ;;  %v232_v20 = vsub.s32 3, %v2328_v13 }
  0x91   :  { %561 = vmatmul.mubr.f32.gmra.mxu0 %v2266_v22  ;;  %674 = vmatmul.mubr.f32.gmra.mxu1 %v2266_v22  ;;  %v2343_v21 = vrot.slane %v2335_v18, %v228_v17  ;;  %v2346_v22 = vrot.slane %v2335_v18, %v224_v19  ;;  %v2349_v23 = vrot.slane %v2335_v18, %v232_v20  ;;  %v236_v20 = vsub.s32 4, %v2328_v13 }
  0x92   :  { %566 = vmatprep.mubr.f32.mxu0 %v2196_v0  ;;  %679 = vmatprep.mubr.f32.mxu1 %v2196_v0 }
  0x95   :  { %567 = vmatmul.mubr.f32.gmra.mxu0 %v2272_v31  ;;  %680 = vmatmul.mubr.f32.gmra.mxu1 %v2272_v31 }
  0x96   :  { %572 = vmatprep.mubr.f32.mxu0 %v2196_v0  ;;  %685 = vmatprep.mubr.f32.mxu1 %v2196_v0 }
  0x99   :  { %573 = vmatmul.mubr.f32.gmra.mxu0 %v2278_v40  ;;  %686 = vmatmul.mubr.f32.gmra.mxu1 %v2278_v40 }
  0x9a   :  { %578 = vmatprep.mubr.f32.mxu0 %v2196_v0  ;;  %691 = vmatprep.mubr.f32.mxu1 %v2196_v0 }
  0x9d   :  { %579 = vmatmul.mubr.f32.gmra.mxu0 %v2284_v49  ;;  %692 = vmatmul.mubr.f32.gmra.mxu1 %v2284_v49 }
  0x9e   :  { %584 = vmatprep.mubr.f32.mxu0 %v2196_v0  ;;  %697 = vmatprep.mubr.f32.mxu1 %v2196_v0 }
  0xa1   :  { %585 = vmatmul.mubr.f32.gmra.mxu0 %v2290_v58  ;;  %698 = vmatmul.mubr.f32.gmra.mxu1 %v2290_v58 }
  0xa2   :  { %590 = vmatprep.mubr.f32.mxu0 %v2196_v0  ;;  %703 = vmatprep.mubr.f32.mxu1 %v2196_v0  ;;  %v2340_v0 = vrot.slane %v2335_v18, %v220_v16 }
  0xa5   :  { %591 = vmatmul.mubr.f32.gmra.mxu0 %v87_v6  ;;  %704 = vmatmul.mubr.f32.gmra.mxu1 %v87_v6 }
 0x119   :  { %v324_v24 = vpop.f32.mrf.mxu0  ;;  %v437_v25 = vpop.f32.mrf.mxu1 }
 0x11a   :  { %v325_v26 = vadd.f32 %v324_v24, %v2340_v0  ;;  %v438_v27 = vadd.f32 %v437_v25, %v2343_v21  ;;  %v244_v24 = vsub.s32 6, %v2328_v13 }
 0x11b   :  { %v326_v28 = vpop.f32.mrf.mxu0  ;;  %v439_v29 = vpop.f32.mrf.mxu1 }
 0x11c   :  { %710 = vst [vmem:[#allocation2] sm:$0xff] %v325_v26  ;;  %712 = vst [vmem:[#allocation2 + $0x10] sm:$0xff] %v438_v27  ;;  %v327_v30 = vadd.f32 %v326_v28, %v2346_v22  ;;  %v440_v31 = vadd.f32 %v439_v29, %v2349_v23  ;;  %v240_v29 = vsub.s32 5, %v2328_v13 }
 0x11e   :  { %711 = vst [vmem:[#allocation2 + $0x8] sm:$0xff] %v327_v30  ;;  %713 = vst [vmem:[#allocation2 + $0x18] sm:$0xff] %v440_v31  ;;  %v248_v30 = vsub.s32 7, %v2328_v13 }
 0x11f   :  { %v330_v32 = vpop.f32.mrf.mxu0  ;;  %v443_v33 = vpop.f32.mrf.mxu1 }
 0x120   :  { %v331_v34 = vadd.f32 %v330_v32, %v2340_v0  ;;  %v444_v35 = vadd.f32 %v443_v33, %v2343_v21  ;;  %v2397_v13 = vrot.slane %v2335_v18, %v248_v30 }
 0x121   :  { %v332_v36 = vpop.f32.mrf.mxu0  ;;  %v445_v37 = vpop.f32.mrf.mxu1 }
 0x122   :  { %718 = vst [vmem:[#allocation2 + $0x40] sm:$0xff] %v331_v34  ;;  %720 = vst [vmem:[#allocation2 + $0x50] sm:$0xff] %v444_v35  ;;  %v333_v38 = vadd.f32 %v332_v36, %v2346_v22  ;;  %v446_v39 = vadd.f32 %v445_v37, %v2349_v23  ;;  %v2388_v35 = vrot.slane %v2335_v18, %v236_v20 }
 0x123   :  { %v2391_v36 = vrot.slane %v2335_v18, %v244_v24 }
 0x124   :  { %719 = vst [vmem:[#allocation2 + $0x48] sm:$0xff] %v333_v38  ;;  %721 = vst [vmem:[#allocation2 + $0x58] sm:$0xff] %v446_v39 }
 0x125   :  { %v336_v40 = vpop.f32.mrf.mxu0  ;;  %v449_v41 = vpop.f32.mrf.mxu1 }
 0x126   :  { %v337_v42 = vadd.f32 %v336_v40, %v2340_v0  ;;  %v450_v43 = vadd.f32 %v449_v41, %v2343_v21 }
 0x127   :  { %v338_v44 = vpop.f32.mrf.mxu0  ;;  %v451_v45 = vpop.f32.mrf.mxu1 }
 0x128   :  { %726 = vst [vmem:[#allocation2 + $0x80] sm:$0xff] %v337_v42  ;;  %728 = vst [vmem:[#allocation2 + $0x90] sm:$0xff] %v450_v43  ;;  %v339_v46 = vadd.f32 %v338_v44, %v2346_v22  ;;  %v452_v47 = vadd.f32 %v451_v45, %v2349_v23 }
 0x12a   :  { %727 = vst [vmem:[#allocation2 + $0x88] sm:$0xff] %v339_v46  ;;  %729 = vst [vmem:[#allocation2 + $0x98] sm:$0xff] %v452_v47 }
 0x12b   :  { %v342_v48 = vpop.f32.mrf.mxu0  ;;  %v455_v49 = vpop.f32.mrf.mxu1 }
 0x12c   :  { %v343_v50 = vadd.f32 %v342_v48, %v2340_v0  ;;  %v456_v51 = vadd.f32 %v455_v49, %v2343_v21 }
 0x12d   :  { %v344_v52 = vpop.f32.mrf.mxu0  ;;  %v457_v53 = vpop.f32.mrf.mxu1 }
 0x12e   :  { %734 = vst [vmem:[#allocation2 + $0xc0] sm:$0xff] %v343_v50  ;;  %736 = vst [vmem:[#allocation2 + $0xd0] sm:$0xff] %v456_v51  ;;  %v345_v54 = vadd.f32 %v344_v52, %v2346_v22  ;;  %v458_v55 = vadd.f32 %v457_v53, %v2349_v23 }
 0x130   :  { %735 = vst [vmem:[#allocation2 + $0xc8] sm:$0xff] %v345_v54  ;;  %737 = vst [vmem:[#allocation2 + $0xd8] sm:$0xff] %v458_v55 }
 0x131   :  { %v348_v56 = vpop.f32.mrf.mxu0  ;;  %v461_v57 = vpop.f32.mrf.mxu1 }
 0x132   :  { %v349_v58 = vadd.f32 %v348_v56, %v2340_v0  ;;  %v462_v59 = vadd.f32 %v461_v57, %v2343_v21 }
 0x133   :  { %v350_v60 = vpop.f32.mrf.mxu0  ;;  %v463_v61 = vpop.f32.mrf.mxu1 }
 0x134   :  { %742 = vst [vmem:[#allocation2 + $0x100] sm:$0xff] %v349_v58  ;;  %744 = vst [vmem:[#allocation2 + $0x110] sm:$0xff] %v462_v59  ;;  %v351_v62 = vadd.f32 %v350_v60, %v2346_v22  ;;  %v464_v63 = vadd.f32 %v463_v61, %v2349_v23 }
 0x136   :  { %743 = vst [vmem:[#allocation2 + $0x108] sm:$0xff] %v351_v62  ;;  %745 = vst [vmem:[#allocation2 + $0x118] sm:$0xff] %v464_v63 }
 0x137   :  { %v354_v2 = vpop.f32.mrf.mxu0  ;;  %v467_v3 = vpop.f32.mrf.mxu1 }
 0x138   :  { %v355_v5 = vadd.f32 %v354_v2, %v2340_v0  ;;  %v468_v6 = vadd.f32 %v467_v3, %v2343_v21 }
 0x139   :  { %v356_v7 = vpop.f32.mrf.mxu0  ;;  %v469_v8 = vpop.f32.mrf.mxu1 }
 0x13a   :  { %750 = vst [vmem:[#allocation2 + $0x140] sm:$0xff] %v355_v5  ;;  %752 = vst [vmem:[#allocation2 + $0x150] sm:$0xff] %v468_v6  ;;  %v357_v9 = vadd.f32 %v356_v7, %v2346_v22  ;;  %v470_v10 = vadd.f32 %v469_v8, %v2349_v23 }
 0x13c   :  { %751 = vst [vmem:[#allocation2 + $0x148] sm:$0xff] %v357_v9  ;;  %753 = vst [vmem:[#allocation2 + $0x158] sm:$0xff] %v470_v10 }
 0x13d   :  { %v360_v11 = vpop.f32.mrf.mxu0  ;;  %v473_v12 = vpop.f32.mrf.mxu1 }
 0x13e   :  { %v361_v14 = vadd.f32 %v360_v11, %v2340_v0  ;;  %v474_v15 = vadd.f32 %v473_v12, %v2343_v21 }
 0x13f   :  { %v362_v4 = vpop.f32.mrf.mxu0  ;;  %v475_v16 = vpop.f32.mrf.mxu1 }
 0x140   :  { %758 = vst [vmem:[#allocation2 + $0x180] sm:$0xff] %v361_v14  ;;  %760 = vst [vmem:[#allocation2 + $0x190] sm:$0xff] %v474_v15  ;;  %v363_v17 = vadd.f32 %v362_v4, %v2346_v22  ;;  %v476_v19 = vadd.f32 %v475_v16, %v2349_v23 }
 0x142   :  { %759 = vst [vmem:[#allocation2 + $0x188] sm:$0xff] %v363_v17  ;;  %761 = vst [vmem:[#allocation2 + $0x198] sm:$0xff] %v476_v19 }
 0x143   :  { %v366_v25 = vpop.f32.mrf.mxu0  ;;  %v479_v26 = vpop.f32.mrf.mxu1 }
 0x144   :  { %v367_v27 = vadd.f32 %v366_v25, %v2340_v0  ;;  %v480_v28 = vadd.f32 %v479_v26, %v2343_v21  ;;  %v2394_v0 = vrot.slane %v2335_v18, %v240_v29 }
 0x145   :  { %v368_v31 = vpop.f32.mrf.mxu0  ;;  %v481_v32 = vpop.f32.mrf.mxu1 }
 0x146   :  { %766 = vst [vmem:[#allocation2 + $0x1c0] sm:$0xff] %v367_v27  ;;  %768 = vst [vmem:[#allocation2 + $0x1d0] sm:$0xff] %v480_v28  ;;  %v369_v33 = vadd.f32 %v368_v31, %v2346_v22  ;;  %v482_v34 = vadd.f32 %v481_v32, %v2349_v23 }
 0x148   :  { %767 = vst [vmem:[#allocation2 + $0x1c8] sm:$0xff] %v369_v33  ;;  %769 = vst [vmem:[#allocation2 + $0x1d8] sm:$0xff] %v482_v34 }
 0x149   :  { %v550_v21 = vpop.f32.mrf.mxu0  ;;  %v663_v37 = vpop.f32.mrf.mxu1 }
 0x14a   :  { %v551_v22 = vadd.f32 %v550_v21, %v2388_v35  ;;  %v664_v23 = vadd.f32 %v663_v37, %v2391_v36 }
 0x14b   :  { %v552_v38 = vpop.f32.mrf.mxu0  ;;  %v665_v39 = vpop.f32.mrf.mxu1 }
 0x14c   :  { %714 = vst [vmem:[#allocation2 + $0x20] sm:$0xff] %v551_v22  ;;  %716 = vst [vmem:[#allocation2 + $0x30] sm:$0xff] %v664_v23  ;;  %v553_v40 = vadd.f32 %v552_v38, %v2394_v0  ;;  %v666_v41 = vadd.f32 %v665_v39, %v2397_v13  ;;  %v2431_v39 = vmov 0.0  }
 0x14d   :  { %v556_v42 = vpop.f32.mrf.mxu0  ;;  %v669_v43 = vpop.f32.mrf.mxu1 }
 0x14e   :  { %715 = vst [vmem:[#allocation2 + $0x28] sm:$0xff] %v553_v40  ;;  %717 = vst [vmem:[#allocation2 + $0x38] sm:$0xff] %v666_v41  ;;  %v557_v18 = vadd.f32 %v556_v42, %v2388_v35  ;;  %v670_v44 = vadd.f32 %v669_v43, %v2391_v36  ;;  %v2433_v40 = vmov 0.0   ;;  %v2435_v41 = vmov 0.0  }
 0x14f   :  { %v558_v45 = vpop.f32.mrf.mxu0  ;;  %v671_v46 = vpop.f32.mrf.mxu1  ;;  %v2437_v42 = vmov 0.0  }
 0x150   :  { %722 = vst [vmem:[#allocation2 + $0x60] sm:$0xff] %v557_v18  ;;  %724 = vst [vmem:[#allocation2 + $0x70] sm:$0xff] %v670_v44  ;;  %v559_v47 = vadd.f32 %v558_v45, %v2394_v0  ;;  %v672_v48 = vadd.f32 %v671_v46, %v2397_v13 }
 0x151   :  { %v562_v49 = vpop.f32.mrf.mxu0  ;;  %v675_v50 = vpop.f32.mrf.mxu1 }
 0x152   :  { %723 = vst [vmem:[#allocation2 + $0x68] sm:$0xff] %v559_v47  ;;  %725 = vst [vmem:[#allocation2 + $0x78] sm:$0xff] %v672_v48  ;;  %v563_v51 = vadd.f32 %v562_v49, %v2388_v35  ;;  %v676_v52 = vadd.f32 %v675_v50, %v2391_v36 }
 0x153   :  { %v564_v53 = vpop.f32.mrf.mxu0  ;;  %v677_v54 = vpop.f32.mrf.mxu1 }
 0x154   :  { %730 = vst [vmem:[#allocation2 + $0xa0] sm:$0xff] %v563_v51  ;;  %732 = vst [vmem:[#allocation2 + $0xb0] sm:$0xff] %v676_v52  ;;  %v565_v55 = vadd.f32 %v564_v53, %v2394_v0  ;;  %v678_v56 = vadd.f32 %v677_v54, %v2397_v13 }
 0x155   :  { %v568_v57 = vpop.f32.mrf.mxu0  ;;  %v681_v58 = vpop.f32.mrf.mxu1 }
 0x156   :  { %731 = vst [vmem:[#allocation2 + $0xa8] sm:$0xff] %v565_v55  ;;  %733 = vst [vmem:[#allocation2 + $0xb8] sm:$0xff] %v678_v56  ;;  %v569_v59 = vadd.f32 %v568_v57, %v2388_v35  ;;  %v682_v60 = vadd.f32 %v681_v58, %v2391_v36 }
 0x157   :  { %v570_v61 = vpop.f32.mrf.mxu0  ;;  %v683_v62 = vpop.f32.mrf.mxu1 }
 0x158   :  { %738 = vst [vmem:[#allocation2 + $0xe0] sm:$0xff] %v569_v59  ;;  %740 = vst [vmem:[#allocation2 + $0xf0] sm:$0xff] %v682_v60  ;;  %v571_v63 = vadd.f32 %v570_v61, %v2394_v0  ;;  %v684_v2 = vadd.f32 %v683_v62, %v2397_v13 }
 0x159   :  { %v574_v3 = vpop.f32.mrf.mxu0  ;;  %v687_v5 = vpop.f32.mrf.mxu1 }
 0x15a   :  { %739 = vst [vmem:[#allocation2 + $0xe8] sm:$0xff] %v571_v63  ;;  %741 = vst [vmem:[#allocation2 + $0xf8] sm:$0xff] %v684_v2  ;;  %v575_v6 = vadd.f32 %v574_v3, %v2388_v35  ;;  %v688_v7 = vadd.f32 %v687_v5, %v2391_v36 }
 0x15b   :  { %v576_v8 = vpop.f32.mrf.mxu0  ;;  %v689_v9 = vpop.f32.mrf.mxu1 }
 0x15c   :  { %746 = vst [vmem:[#allocation2 + $0x120] sm:$0xff] %v575_v6  ;;  %748 = vst [vmem:[#allocation2 + $0x130] sm:$0xff] %v688_v7  ;;  %v577_v10 = vadd.f32 %v576_v8, %v2394_v0  ;;  %v690_v11 = vadd.f32 %v689_v9, %v2397_v13 }
 0x15d   :  { %v580_v12 = vpop.f32.mrf.mxu0  ;;  %v693_v14 = vpop.f32.mrf.mxu1 }
 0x15e   :  { %747 = vst [vmem:[#allocation2 + $0x128] sm:$0xff] %v577_v10  ;;  %749 = vst [vmem:[#allocation2 + $0x138] sm:$0xff] %v690_v11  ;;  %v581_v15 = vadd.f32 %v580_v12, %v2388_v35  ;;  %v694_v4 = vadd.f32 %v693_v14, %v2391_v36 }
 0x15f   :  { %v582_v16 = vpop.f32.mrf.mxu0  ;;  %v695_v17 = vpop.f32.mrf.mxu1 }
 0x160   :  { %754 = vst [vmem:[#allocation2 + $0x160] sm:$0xff] %v581_v15  ;;  %756 = vst [vmem:[#allocation2 + $0x170] sm:$0xff] %v694_v4  ;;  %v583_v19 = vadd.f32 %v582_v16, %v2394_v0  ;;  %v696_v20 = vadd.f32 %v695_v17, %v2397_v13 }
 0x161   :  { %v586_v24 = vpop.f32.mrf.mxu0  ;;  %v699_v25 = vpop.f32.mrf.mxu1 }
 0x162   :  { %755 = vst [vmem:[#allocation2 + $0x168] sm:$0xff] %v583_v19  ;;  %757 = vst [vmem:[#allocation2 + $0x178] sm:$0xff] %v696_v20  ;;  %v587_v26 = vadd.f32 %v586_v24, %v2388_v35  ;;  %v700_v27 = vadd.f32 %v699_v25, %v2391_v36 }
 0x163   :  { %v588_v28 = vpop.f32.mrf.mxu0  ;;  %v701_v29 = vpop.f32.mrf.mxu1 }
 0x164   :  { %762 = vst [vmem:[#allocation2 + $0x1a0] sm:$0xff] %v587_v26  ;;  %764 = vst [vmem:[#allocation2 + $0x1b0] sm:$0xff] %v700_v27  ;;  %v589_v30 = vadd.f32 %v588_v28, %v2394_v0  ;;  %v702_v31 = vadd.f32 %v701_v29, %v2397_v13 }
 0x165   :  { %v592_v32 = vpop.f32.mrf.mxu0  ;;  %v705_v33 = vpop.f32.mrf.mxu1 }
 0x166   :  { %763 = vst [vmem:[#allocation2 + $0x1a8] sm:$0xff] %v589_v30  ;;  %765 = vst [vmem:[#allocation2 + $0x1b8] sm:$0xff] %v702_v31  ;;  %v593_v34 = vadd.f32 %v592_v32, %v2388_v35  ;;  %v706_v21 = vadd.f32 %v705_v33, %v2391_v36 }
 0x167   :  { %v594_v37 = vpop.f32.mrf.mxu0  ;;  %v707_v22 = vpop.f32.mrf.mxu1 }
 0x168   :  { %770 = vst [vmem:[#allocation2 + $0x1e0] sm:$0xff] %v593_v34  ;;  %772 = vst [vmem:[#allocation2 + $0x1f0] sm:$0xff] %v706_v21  ;;  %v595_v23 = vadd.f32 %v594_v37, %v2394_v0  ;;  %v708_v38 = vadd.f32 %v707_v22, %v2397_v13 }
 0x16a   :  { %771 = vst [vmem:[#allocation2 + $0x1e8] sm:$0xff] %v595_v23  ;;  %773 = vst [vmem:[#allocation2 + $0x1f8] sm:$0xff] %v708_v38 }
 0x16b LB: > { %3166 = vst [vmem:[#allocation16_spill] sm:$0xff] %v2168_v39  ;;  %3167 = vst [vmem:[#allocation17_spill] sm:$0xff] %v2176_v41  ;;  %v2456_v35 = vld [vmem:[#allocation8 + $0x1e8] sm:$0xff]  ;;  %v2458_v36 = vld [vmem:[#allocation8 + $0x1e0] sm:$0xff]  ;;  %v3091_v43 = vmov 0.0   ;;  %v3089_v45 = vmov 0   ;;  %s2184_s3 = sphi %s2439_s3, %s779_s3   ;;  %v2180_v42 = vphi %v2437_v42, %v1556_v42   ;;  %v2176_v41 = vphi %v2435_v41, %v1557_v41   ;;  %v2172_v40 = vphi %v2433_v40, %v1813_v40   ;;  %v2168_v39 = vphi %v2431_v39, %v3314_v39  }
 0x16c   : > { %3168 = vst [vmem:[#allocation18_spill] sm:$0xff] %v2180_v42  ;;  %v2460_v0 = vld [vmem:[#allocation8 + $0x1c8] sm:$0xff]  ;;  %861 = vmatprep.subr.mxu0 %v2456_v35  ;;  %v2463_v13 = vld [vmem:[#allocation8 + $0x1c0] sm:$0xff]  ;;  %925 = vmatprep.mubr.f32.mxu0 %v3091_v43  ;;  %v2481_v48 = vld [vmem:[#allocation8 + $0x1f8] sm:$0xff]  ;;  %s2782_s22 = sshll.u32 %s2184_s3, 1  ;;  %s1873_s26 = sshll.u32 %s2184_s3, 4 }
 0x16d   : > { %862 = vmatpush1.msra.mxu0 %v2458_v36  ;;  %v2467_v18 = vld [vmem:[#allocation8 + $0x1a8] sm:$0xff]  ;;  %996 = vmatprep.mubr.f32.mxu1 %v3091_v43  ;;  %v2471_v44 = vld [vmem:[#allocation8 + $0x1a0] sm:$0xff]  ;;  %v2487_v50 = vld [vmem:[#allocation8 + $0x1f0] sm:$0xff]  ;;  %s785_s23 = ssub.s32 7, %s2782_s22  ;;  %s1302_s24 = sadd.s32 1, %s2782_s22 }
 0x16e   : > { %863 = vmatprep.subr.mxu0 %v2460_v0  ;;  %1972 = vset.pattern.permute.xlu0 %v3089_v45  ;;  %v2475_v46 = vld [vmem:[#allocation8 + $0x188] sm:$0xff]  ;;  %v2479_v47 = vld [vmem:[#allocation8 + $0x180] sm:$0xff]  ;;  %v2493_v52 = vld [vmem:[#allocation8 + $0x1d8] sm:$0xff]  ;;  %s1303_s25 = ssub.s32 6, %s2782_s22  ;;  %s2940_s27 = sshra.s32 %s1873_s26, 3 }
 0x16f   : > { %864 = vmatpush1.msra.mxu0 %v2463_v13  ;;  %1973 = vset.pattern.permute.xlu1 %v3089_v45  ;;  %v2484_v49 = vld [vmem:[#allocation8 + $0x168] sm:$0xff]  ;;  %v2490_v51 = vld [vmem:[#allocation8 + $0x160] sm:$0xff]  ;;  %v2495_v53 = vld [vmem:[#allocation8 + $0x1d0] sm:$0xff]  ;;  %s1905_s28 = sshll.u32 %s2940_s27, 6  ;;  %s2945_s30 = sshll.u32 %s785_s23, 3 }
 0x170   : > { %865 = vmatprep.subr.mxu0 %v2467_v18  ;;  %932 = vmatprep.subr.mxu1 %v2481_v48  ;;  %v2498_v54 = vld [vmem:[#allocation8 + $0x148] sm:$0xff]  ;;  %v2501_v55 = vld [vmem:[#allocation8 + $0x1b8] sm:$0xff]  ;;  %v2504_v56 = vld [vmem:[#allocation8 + $0x140] sm:$0xff]  ;;  %s792_s29 = scalar_lea.vmem [#allocation2], %s1905_s28  ;;  %s1045_s7 = sshra.s32 %s2945_s30, 3 }
 0x171   : > { %866 = vmatpush1.msra.mxu0 %v2471_v44  ;;  %933 = vmatpush1.msra.mxu1 %v2487_v50  ;;  %v2507_v57 = vld [vmem:[#allocation8 + $0x1b0] sm:$0xff]  ;;  %v2509_v58 = vld [vmem:[#allocation8 + $0x198] sm:$0xff]  ;;  %v2512_v59 = vld [vmem:[#allocation8 + $0x128] sm:$0xff]  ;;  %s1907_s8 = sshll.u32 %s1045_s7, 6  ;;  %s1906_s10 = sshll.u32 %s2940_s27, 4 }
 0x172   : > { %867 = vmatprep.subr.mxu0 %v2475_v46  ;;  %934 = vmatprep.subr.mxu1 %v2493_v52  ;;  %v2515_v60 = vld [vmem:[#allocation8 + $0x190] sm:$0xff]  ;;  %v2518_v61 = vld [vmem:[#allocation8 + $0x120] sm:$0xff]  ;;  %v2521_v62 = vld [vmem:[#allocation8 + $0x178] sm:$0xff]  ;;  %s1049_s9 = scalar_lea.vmem [#allocation2], %s1907_s8  ;;  %s1043_s11 = scalar_lea.vmem [#allocation11], %s1906_s10 }
 0x173   : > { %868 = vmatpush1.msra.mxu0 %v2479_v47  ;;  %935 = vmatpush1.msra.mxu1 %v2495_v53  ;;  %v2524_v63 = vld [vmem:[#allocation8 + $0x108] sm:$0xff]  ;;  %v2527_v2 = vld [vmem:[#allocation8 + $0x170] sm:$0xff]  ;;  %v2530_v3 = vld [vmem:[#allocation8 + $0x100] sm:$0xff]  ;;  %s1908_s12 = sshll.u32 %s1045_s7, 4  ;;  %s3043_s13 = sadd.s32 8, %s1873_s26 }
 0x174   : > { %869 = vmatprep.subr.mxu0 %v2484_v49  ;;  %936 = vmatprep.subr.mxu1 %v2501_v55  ;;  %v2533_v5 = vld [vmem:[#allocation8 + $0x158] sm:$0xff]  ;;  %v2536_v6 = vld [vmem:[#allocation8 + $0xe8] sm:$0xff]  ;;  %v2539_v7 = vld [vmem:[#allocation8 + $0x150] sm:$0xff]  ;;  %s1300_s2 = scalar_lea.vmem [#allocation11], %s1908_s12  ;;  %s1306_s14 = sshra.s32 %s3043_s13, 3 }
 0x175   : > { %870 = vmatpush1.msra.mxu0 %v2490_v51  ;;  %937 = vmatpush1.msra.mxu1 %v2507_v57  ;;  %v2542_v8 = vld [vmem:[#allocation8 + $0xe0] sm:$0xff]  ;;  %v2545_v9 = vld [vmem:[#allocation8 + $0x138] sm:$0xff]  ;;  %v2548_v10 = vld [vmem:[#allocation8 + $0xc8] sm:$0xff]  ;;  %s1911_s15 = sshll.u32 %s1306_s14, 6  ;;  %s3050_s17 = sshll.u32 %s1303_s25, 3 }
 0x176   : > { %871 = vmatprep.subr.mxu0 %v2498_v54  ;;  %938 = vmatprep.subr.mxu1 %v2509_v58  ;;  %v2551_v11 = vld [vmem:[#allocation8 + $0x130] sm:$0xff]  ;;  %v2554_v12 = vld [vmem:[#allocation8 + $0xc0] sm:$0xff]  ;;  %v2557_v14 = vld [vmem:[#allocation8 + $0x118] sm:$0xff]  ;;  %s1310_s16 = scalar_lea.vmem [#allocation2], %s1911_s15  ;;  %s1563_s18 = sshra.s32 %s3050_s17, 3 }
 0x177   : > { %872 = vmatpush1.msra.mxu0 %v2504_v56  ;;  %939 = vmatpush1.msra.mxu1 %v2515_v60  ;;  %v2560_v15 = vld [vmem:[#allocation8 + $0xa8] sm:$0xff]  ;;  %v2563_v4 = vld [vmem:[#allocation8 + $0x110] sm:$0xff]  ;;  %v2566_v16 = vld [vmem:[#allocation8 + $0xa0] sm:$0xff]  ;;  %s1913_s0 = sshll.u32 %s1563_s18, 6  ;;  %s1912_s20 = sshll.u32 %s1306_s14, 4 }
 0x178   : > { %873 = vmatprep.subr.mxu0 %v2512_v59  ;;  %940 = vmatprep.subr.mxu1 %v2521_v62  ;;  %v2569_v17 = vld [vmem:[#allocation8 + $0xf8] sm:$0xff]  ;;  %v2572_v19 = vld [vmem:[#allocation8 + $0x88] sm:$0xff]  ;;  %v2575_v20 = vld [vmem:[#allocation8 + $0xf0] sm:$0xff]  ;;  %s1567_s19 = scalar_lea.vmem [#allocation2], %s1913_s0  ;;  %s1561_s4 = scalar_lea.vmem [#allocation11], %s1912_s20 }
 0x179   : > { %874 = vmatpush1.msra.mxu0 %v2518_v61  ;;  %941 = vmatpush1.msra.mxu1 %v2527_v2  ;;  %v2578_v24 = vld [vmem:[#allocation8 + $0x80] sm:$0xff]  ;;  %v2581_v25 = vld [vmem:[#allocation8 + $0xd8] sm:$0xff]  ;;  %v2584_v26 = vld [vmem:[#allocation8 + $0x68] sm:$0xff]  ;;  %s1914_s21 = sshll.u32 %s1563_s18, 4  ;;  %s779_s3 = sadd.s32 1, %s2184_s3  }
 0x17a   : > { %875 = vmatprep.subr.mxu0 %v2524_v63  ;;  %942 = vmatprep.subr.mxu1 %v2533_v5  ;;  %v2587_v27 = vld [vmem:[#allocation8 + $0xd0] sm:$0xff]  ;;  %v2590_v28 = vld [vmem:[#allocation8 + $0x60] sm:$0xff]  ;;  %v2593_v29 = vld [vmem:[#allocation8 + $0xb8] sm:$0xff]  ;;  %s1818_s1 = scalar_lea.vmem [#allocation11], %s1914_s21  ;;  %p776_p6 = scmp.ge.s32.totalorder %s779_s3, 4  }
 0x17b   : > { %876 = vmatpush1.msra.mxu0 %v2530_v3  ;;  %943 = vmatpush1.msra.mxu1 %v2539_v7  ;;  %v2596_v30 = vld [vmem:[#allocation8 + $0x48] sm:$0xff]  ;;  %v2599_v31 = vld [vmem:[#allocation8 + $0xb0] sm:$0xff]  ;;  %v2602_v32 = vld [vmem:[#allocation8 + $0x40] sm:$0xff]  ;;  %s2199_s5 = smov (%p776_p6), [#allocation11]  }
 0x17c   : > { %877 = vmatprep.subr.mxu0 %v2536_v6  ;;  %944 = vmatprep.subr.mxu1 %v2545_v9  ;;  %3169 = vst [vmem:[#allocation19_spill] sm:$0xff] %v2596_v30  ;;  %3170 = vst [vmem:[#allocation20_spill] sm:$0xff] %v2602_v32  ;;  %v2605_v33 = vld [vmem:[#allocation8 + $0x98] sm:$0xff]  ;;  %v2608_v34 = vld [vmem:[#allocation8 + $0x28] sm:$0xff] }
 0x17d   : > { %878 = vmatpush1.msra.mxu0 %v2542_v8  ;;  %945 = vmatpush1.msra.mxu1 %v2551_v11  ;;  %3171 = vst [vmem:[#allocation21_spill] sm:$0xff] %v2608_v34  ;;  %v2611_v21 = vld [vmem:[#allocation8 + $0x90] sm:$0xff]  ;;  %v2614_v37 = vld [vmem:[#allocation8 + $0x20] sm:$0xff]  ;;  %v2617_v22 = vld [vmem:[#allocation8 + $0x78] sm:$0xff] }
 0x17e   : > { %879 = vmatprep.subr.mxu0 %v2548_v10  ;;  %946 = vmatprep.subr.mxu1 %v2557_v14  ;;  %3172 = vst [vmem:[#allocation22_spill] sm:$0xff] %v2611_v21  ;;  %3173 = vst [vmem:[#allocation23_spill] sm:$0xff] %v2614_v37  ;;  %v2620_v23 = vld [vmem:[#allocation8 + $0x8] sm:$0xff]  ;;  %v2623_v38 = vld [vmem:[#allocation8 + $0x70] sm:$0xff] }
 0x17f   : > { %880 = vmatpush1.msra.mxu0 %v2554_v12  ;;  %947 = vmatpush1.msra.mxu1 %v2563_v4  ;;  %3174 = vst [vmem:[#allocation24_spill] sm:$0xff] %v2617_v22  ;;  %3175 = vst [vmem:[#allocation25_spill] sm:$0xff] %v2620_v23  ;;  %v2626_v45 = vld [vmem:[#allocation8] sm:$0xff]  ;;  %v2629_v43 = vld [vmem:[#allocation8 + $0x58] sm:$0xff] }
 0x180   : > { %881 = vmatprep.subr.mxu0 %v2560_v15  ;;  %948 = vmatprep.subr.mxu1 %v2569_v17  ;;  %3176 = vst [vmem:[#allocation26_spill] sm:$0xff] %v2623_v38  ;;  %3177 = vst [vmem:[#allocation27_spill] sm:$0xff] %v2626_v45  ;;  %v2632_v39 = vld [vmem:[#allocation9 + $0x1e8] sm:$0xff]  ;;  %v2636_v41 = vld [vmem:[#allocation9 + $0x1e0] sm:$0xff] }
 0x181   : > { %882 = vmatpush1.msra.mxu0 %v2566_v16  ;;  %949 = vmatpush1.msra.mxu1 %v2575_v20  ;;  %3178 = vst [vmem:[#allocation28_spill] sm:$0xff] %v2629_v43  ;;  %3179 = vst [vmem:[#allocation29_spill] sm:$0xff] %v2632_v39 }
 0x182   : > { %883 = vmatprep.subr.mxu0 %v2572_v19  ;;  %950 = vmatprep.subr.mxu1 %v2581_v25  ;;  %3180 = vst [vmem:[#allocation30_spill] sm:$0xff] %v2636_v41 }
 0x183   : > { %884 = vmatpush1.msra.mxu0 %v2578_v24  ;;  %951 = vmatpush1.msra.mxu1 %v2587_v27 }
 0x184   : > { %885 = vmatprep.subr.mxu0 %v2584_v26  ;;  %952 = vmatprep.subr.mxu1 %v2593_v29 }
 0x185   : > { %886 = vmatpush1.msra.mxu0 %v2590_v28  ;;  %953 = vmatpush1.msra.mxu1 %v2599_v31 }
 0x186   : > { %887 = vmatprep.subr.mxu0 %v2596_v30  ;;  %954 = vmatprep.subr.mxu1 %v2605_v33  ;;  %v2645_v30 = vld [vmem:[#allocation8 + $0x38] sm:$0xff] }
 0x187   : > { %888 = vmatpush1.msra.mxu0 %v2602_v32  ;;  %955 = vmatpush1.msra.mxu1 %v2611_v21  ;;  %v2639_v32 = vld [vmem:[#allocation8 + $0x50] sm:$0xff]  ;;  %3183 = vst [vmem:[#allocation33_spill] sm:$0xff] %v2645_v30  ;;  %v1031_v21 = vstv %s2782_s22  ;;  %s1825_s22 = sshll.u32 (%p776_p6), %s2199_s5, 4  ;;  %s1826_s22 = int_to_ptr.vmem [resolvable:$true] %s1825_s22 }
 0x188   : > { %889 = vmatprep.subr.mxu0 %v2608_v34  ;;  %956 = vmatprep.subr.mxu1 %v2617_v22  ;;  %3181 = vst [vmem:[#allocation31_spill] sm:$0xff] %v2639_v32  ;;  %v2642_v34 = vld [vmem:[#allocation9 + $0x1c8] sm:$0xff]  ;;  %v2663_v22 = vld [vmem:[#allocation8 + $0x10] sm:$0xff]  ;;  %vm1032_vm0 = vcmp.gt.s32.totalorder %v2254_v1, %v1031_v21  ;;  %v3240_v21 = vmov 0   ;;  %p2123_p8 = scmp.lt.s32.totalorder (%p776_p6), %s1826_s22, %s1826_s22 }
 0x189   : > { %890 = vmatpush1.msra.mxu0 %v2614_v37  ;;  %957 = vmatpush1.msra.mxu1 %v2623_v38  ;;  %3182 = vst [vmem:[#allocation32_spill] sm:$0xff] %v2642_v34  ;;  %v2649_v37 = vld [vmem:[#allocation9 + $0x1c0] sm:$0xff]  ;;  %v2654_v38 = vld [vmem:[#allocation9 + $0x1a8] sm:$0xff]  ;;  %3189 = vst [vmem:[#allocation39_spill] sm:$0xff] %v2663_v22 }
 0x18a   : > { %891 = vmatprep.subr.mxu0 %v2620_v23  ;;  %958 = vmatprep.subr.mxu1 %v2629_v43  ;;  %3184 = vst [vmem:[#allocation34_spill] sm:$0xff] %v2649_v37  ;;  %v2651_v23 = vld [vmem:[#allocation8 + $0x30] sm:$0xff]  ;;  %3186 = vst [vmem:[#allocation36_spill] sm:$0xff] %v2654_v38  ;;  %v2660_v43 = vld [vmem:[#allocation9 + $0x1a0] sm:$0xff] }
 0x18b   : > { %892 = vmatpush1.msra.mxu0 %v2626_v45  ;;  %3185 = vst [vmem:[#allocation35_spill] sm:$0xff] %v2651_v23  ;;  %959 = vmatpush1.msra.mxu1 %v2639_v32  ;;  %v2657_v45 = vld [vmem:[#allocation8 + $0x18] sm:$0xff]  ;;  %3188 = vst [vmem:[#allocation38_spill] sm:$0xff] %v2660_v43  ;;  %v2672_v32 = vld [vmem:[#allocation9 + $0x180] sm:$0xff] }
 0x18c   : > { %926 = vmatmul.mubr.f32.vlgmr.msra.gmra.mxu0 %v2180_v42  ;;  %1118 = vmatprep.subr.mxu0 %v2632_v39  ;;  %3187 = vst [vmem:[#allocation37_spill] sm:$0xff] %v2657_v45  ;;  %v2666_v39 = vld [vmem:[#allocation9 + $0x188] sm:$0xff]  ;;  %3192 = vst [vmem:[#allocation42_spill] sm:$0xff] %v2672_v32 }
 0x18d   : > { %1119 = vmatpush1.msra.mxu0 %v2636_v41  ;;  %960 = vmatprep.subr.mxu1 %v2645_v30  ;;  %3190 = vst [vmem:[#allocation40_spill] sm:$0xff] %v2666_v39  ;;  %v2669_v41 = vld [vmem:[#allocation9 + $0x1f8] sm:$0xff]  ;;  %v2679_v30 = vld [vmem:[#allocation9 + $0x1f0] sm:$0xff] }
 0x18e   : > { %1120 = vmatprep.subr.mxu0 %v2642_v34  ;;  %961 = vmatpush1.msra.mxu1 %v2651_v23  ;;  %3191 = vst [vmem:[#allocation41_spill] sm:$0xff] %v2669_v41  ;;  %v2676_v34 = vld [vmem:[#allocation9 + $0x168] sm:$0xff]  ;;  %3194 = vst [vmem:[#allocation44_spill] sm:$0xff] %v2679_v30  ;;  %v2685_v23 = vld [vmem:[#allocation9 + $0x1d8] sm:$0xff] }
 0x18f   : > { %1121 = vmatpush1.msra.mxu0 %v2649_v37  ;;  %962 = vmatprep.subr.mxu1 %v2657_v45  ;;  %3193 = vst [vmem:[#allocation43_spill] sm:$0xff] %v2676_v34  ;;  %v2682_v37 = vld [vmem:[#allocation9 + $0x160] sm:$0xff]  ;;  %3196 = vst [vmem:[#allocation46_spill] sm:$0xff] %v2685_v23  ;;  %v2797_v45 = vld [vmem:[#allocation9 + $0x28] sm:$0xff] }
 0x190   : > { %1122 = vmatprep.subr.mxu0 %v2654_v38  ;;  %963 = vmatpush1.msra.mxu1 %v2663_v22  ;;  %3195 = vst [vmem:[#allocation45_spill] sm:$0xff] %v2682_v37  ;;  %v2688_v38 = vld [vmem:[#allocation9 + $0x148] sm:$0xff]  ;;  %v2694_v22 = vld [vmem:[#allocation9 + $0x140] sm:$0xff]  ;;  %3232 = vst [vmem:[#allocation81_spill] sm:$0xff] %v2797_v45 }
 0x191   : > { %1123 = vmatpush1.msra.mxu0 %v2660_v43  ;;  %1189 = vmatprep.subr.mxu1 %v2669_v41  ;;  %3197 = vst [vmem:[#allocation47_spill] sm:$0xff] %v2688_v38  ;;  %v2691_v43 = vld [vmem:[#allocation9 + $0x1d0] sm:$0xff]  ;;  %3199 = vst [vmem:[#allocation49_spill] sm:$0xff] %v2694_v22  ;;  %v2700_v41 = vld [vmem:[#allocation9 + $0x128] sm:$0xff] }
 0x192   : > { %1124 = vmatprep.subr.mxu0 %v2666_v39  ;;  %997 = vmatmul.mubr.f32.vlgmr.msra.gmra.mxu1 %v2180_v42  ;;  %3198 = vst [vmem:[#allocation48_spill] sm:$0xff] %v2691_v43  ;;  %v2697_v39 = vld [vmem:[#allocation9 + $0x1b8] sm:$0xff]  ;;  %3201 = vst [vmem:[#allocation51_spill] sm:$0xff] %v2700_v41  ;;  %v2706_v42 = vld [vmem:[#allocation9 + $0x120] sm:$0xff] }
 0x193   : > { %1125 = vmatpush1.msra.mxu0 %v2672_v32  ;;  %1190 = vmatpush1.msra.mxu1 %v2679_v30  ;;  %3200 = vst [vmem:[#allocation50_spill] sm:$0xff] %v2697_v39  ;;  %v2703_v32 = vld [vmem:[#allocation9 + $0x1b0] sm:$0xff]  ;;  %3203 = vst [vmem:[#allocation53_spill] sm:$0xff] %v2706_v42  ;;  %v2712_v30 = vld [vmem:[#allocation9 + $0x108] sm:$0xff] }
 0x194   : > { %1126 = vmatprep.subr.mxu0 %v2676_v34  ;;  %1191 = vmatprep.subr.mxu1 %v2685_v23  ;;  %3202 = vst [vmem:[#allocation52_spill] sm:$0xff] %v2703_v32  ;;  %v2709_v34 = vld [vmem:[#allocation9 + $0x198] sm:$0xff]  ;;  %3205 = vst [vmem:[#allocation55_spill] sm:$0xff] %v2712_v30  ;;  %v2718_v23 = vld [vmem:[#allocation9 + $0x100] sm:$0xff] }
 0x195   : > { %1127 = vmatpush1.msra.mxu0 %v2682_v37  ;;  %1192 = vmatpush1.msra.mxu1 %v2691_v43  ;;  %3204 = vst [vmem:[#allocation54_spill] sm:$0xff] %v2709_v34  ;;  %v2715_v37 = vld [vmem:[#allocation9 + $0x190] sm:$0xff]  ;;  %3207 = vst [vmem:[#allocation57_spill] sm:$0xff] %v2718_v23  ;;  %v2724_v43 = vld [vmem:[#allocation9 + $0xe8] sm:$0xff] }
 0x196   : > { %1128 = vmatprep.subr.mxu0 %v2688_v38  ;;  %1193 = vmatprep.subr.mxu1 %v2697_v39  ;;  %3206 = vst [vmem:[#allocation56_spill] sm:$0xff] %v2715_v37  ;;  %v2721_v38 = vld [vmem:[#allocation9 + $0x178] sm:$0xff]  ;;  %3209 = vst [vmem:[#allocation59_spill] sm:$0xff] %v2724_v43  ;;  %v2730_v39 = vld [vmem:[#allocation9 + $0xe0] sm:$0xff] }
 0x197   : > { %1129 = vmatpush1.msra.mxu0 %v2694_v22  ;;  %1194 = vmatpush1.msra.mxu1 %v2703_v32  ;;  %3208 = vst [vmem:[#allocation58_spill] sm:$0xff] %v2721_v38  ;;  %v2727_v22 = vld [vmem:[#allocation9 + $0x170] sm:$0xff]  ;;  %3211 = vst [vmem:[#allocation61_spill] sm:$0xff] %v2730_v39  ;;  %v2736_v32 = vld [vmem:[#allocation9 + $0xc8] sm:$0xff] }
 0x198   : > { %1130 = vmatprep.subr.mxu0 %v2700_v41  ;;  %1195 = vmatprep.subr.mxu1 %v2709_v34  ;;  %3210 = vst [vmem:[#allocation60_spill] sm:$0xff] %v2727_v22  ;;  %v2733_v41 = vld [vmem:[#allocation9 + $0x158] sm:$0xff]  ;;  %3213 = vst [vmem:[#allocation63_spill] sm:$0xff] %v2736_v32  ;;  %v2742_v34 = vld [vmem:[#allocation9 + $0xc0] sm:$0xff] }
 0x199   : > { %1131 = vmatpush1.msra.mxu0 %v2706_v42  ;;  %1196 = vmatpush1.msra.mxu1 %v2715_v37  ;;  %3212 = vst [vmem:[#allocation62_spill] sm:$0xff] %v2733_v41  ;;  %v2739_v42 = vld [vmem:[#allocation9 + $0x150] sm:$0xff]  ;;  %3215 = vst [vmem:[#allocation65_spill] sm:$0xff] %v2742_v34  ;;  %v2748_v37 = vld [vmem:[#allocation9 + $0xa8] sm:$0xff] }
 0x19a   : > { %1132 = vmatprep.subr.mxu0 %v2712_v30  ;;  %1197 = vmatprep.subr.mxu1 %v2721_v38  ;;  %3214 = vst [vmem:[#allocation64_spill] sm:$0xff] %v2739_v42  ;;  %v2745_v30 = vld [vmem:[#allocation9 + $0x138] sm:$0xff]  ;;  %3217 = vst [vmem:[#allocation67_spill] sm:$0xff] %v2748_v37  ;;  %v2754_v38 = vld [vmem:[#allocation9 + $0xa0] sm:$0xff] }
 0x19b   : > { %1133 = vmatpush1.msra.mxu0 %v2718_v23  ;;  %1198 = vmatpush1.msra.mxu1 %v2727_v22  ;;  %3216 = vst [vmem:[#allocation66_spill] sm:$0xff] %v2745_v30  ;;  %v2751_v23 = vld [vmem:[#allocation9 + $0x130] sm:$0xff]  ;;  %3219 = vst [vmem:[#allocation69_spill] sm:$0xff] %v2754_v38  ;;  %v2760_v22 = vld [vmem:[#allocation9 + $0x88] sm:$0xff] }
 0x19c   : > { %1134 = vmatprep.subr.mxu0 %v2724_v43  ;;  %1199 = vmatprep.subr.mxu1 %v2733_v41  ;;  %3218 = vst [vmem:[#allocation68_spill] sm:$0xff] %v2751_v23  ;;  %v2757_v43 = vld [vmem:[#allocation9 + $0x118] sm:$0xff]  ;;  %3221 = vst [vmem:[#allocation71_spill] sm:$0xff] %v2760_v22 }
 0x19d   : > { %1135 = vmatpush1.msra.mxu0 %v2730_v39  ;;  %1200 = vmatpush1.msra.mxu1 %v2739_v42  ;;  %3220 = vst [vmem:[#allocation70_spill] sm:$0xff] %v2757_v43  ;;  %v2764_v39 = vld [vmem:[#allocation9 + $0x80] sm:$0xff]  ;;  %v2770_v42 = vld [vmem:[#allocation9 + $0x68] sm:$0xff]  ;;  %v2773_v41 = vld [vmem:[#allocation9 + $0xf8] sm:$0xff] }
 0x19e   : > { %1136 = vmatprep.subr.mxu0 %v2736_v32  ;;  %1201 = vmatprep.subr.mxu1 %v2745_v30  ;;  %3222 = vst [vmem:[#allocation72_spill] sm:$0xff] %v2764_v39  ;;  %v2767_v32 = vld [vmem:[#allocation9 + $0x110] sm:$0xff]  ;;  %3224 = vst [vmem:[#allocation74_spill] sm:$0xff] %v2770_v42  ;;  %v3227_v30 = vmov 0.0  }
 0x19f   : > { %1137 = vmatpush1.msra.mxu0 %v2742_v34  ;;  %1202 = vmatpush1.msra.mxu1 %v2751_v23  ;;  %3223 = vst [vmem:[#allocation73_spill] sm:$0xff] %v2767_v32  ;;  %3225 = vst [vmem:[#allocation75_spill] sm:$0xff] %v2773_v41  ;;  %v2776_v34 = vld [vmem:[#allocation9 + $0x60] sm:$0xff]  ;;  %v2794_v23 = vld [vmem:[#allocation9 + $0xd0] sm:$0xff] }
 0x1a0   : > { %1138 = vmatprep.subr.mxu0 %v2748_v37  ;;  %1203 = vmatprep.subr.mxu1 %v2757_v43  ;;  %3226 = vst [vmem:[#allocation76_spill] sm:$0xff] %v2776_v34  ;;  %v2779_v37 = vld [vmem:[#allocation9 + $0xf0] sm:$0xff]  ;;  %v2788_v43 = vld [vmem:[#allocation9 + $0xd8] sm:$0xff]  ;;  %3231 = vst [vmem:[#allocation80_spill] sm:$0xff] %v2794_v23 }
 0x1a1   : > { %1139 = vmatpush1.msra.mxu0 %v2754_v38  ;;  %1182 = vmatprep.mubr.f32.mxu0 %v3227_v30  ;;  %3228 = vst [vmem:[#allocation77_spill] sm:$0xff] %v2779_v37  ;;  %v2785_v38 = vld [vmem:[#allocation9 + $0x48] sm:$0xff] }
 0x1a2   : > { %1140 = vmatprep.subr.mxu0 %v2760_v22  ;;  %3229 = vst [vmem:[#allocation78_spill] sm:$0xff] %v2785_v38  ;;  %1204 = vmatpush1.msra.mxu1 %v2767_v32  ;;  %v2791_v22 = vld [vmem:[#allocation9 + $0x40] sm:$0xff] }
 0x1a3   : > { %1141 = vmatpush1.msra.mxu0 %v2764_v39  ;;  %3230 = vst [vmem:[#allocation79_spill] sm:$0xff] %v2791_v22  ;;  %1205 = vmatprep.subr.mxu1 %v2773_v41  ;;  %v2800_v39 = vld [vmem:[#allocation9 + $0xb8] sm:$0xff]  ;;  %v2804_v32 = vld [vmem:[#allocation9 + $0x20] sm:$0xff] }
 0x1a4   : > { %1142 = vmatprep.subr.mxu0 %v2770_v42  ;;  %1206 = vmatpush1.msra.mxu1 %v2779_v37  ;;  %3233 = vst [vmem:[#allocation82_spill] sm:$0xff] %v2800_v39  ;;  %3234 = vst [vmem:[#allocation83_spill] sm:$0xff] %v2804_v32  ;;  %v2807_v42 = vld [vmem:[#allocation9 + $0xb0] sm:$0xff]  ;;  %v2814_v37 = vld [vmem:[#allocation9 + $0x98] sm:$0xff] }
 0x1a5   : > { %1143 = vmatpush1.msra.mxu0 %v2776_v34  ;;  %1207 = vmatprep.subr.mxu1 %v2788_v43  ;;  %3235 = vst [vmem:[#allocation84_spill] sm:$0xff] %v2807_v42  ;;  %v2811_v34 = vld [vmem:[#allocation9 + $0x8] sm:$0xff]  ;;  %v2817_v41 = vld [vmem:[#allocation9] sm:$0xff] }
 0x1a6   : > { %1144 = vmatprep.subr.mxu0 %v2785_v38  ;;  %3236 = vst [vmem:[#allocation85_spill] sm:$0xff] %v2811_v34  ;;  %1208 = vmatpush1.msra.mxu1 %v2794_v23  ;;  %3237 = vst [vmem:[#allocation86_spill] sm:$0xff] %v2817_v41  ;;  %v2820_v38 = vld [vmem:[#allocation9 + $0x90] sm:$0xff]  ;;  %v1288_v23 = vstv %s785_s23  ;;  %s2118_s23 = scalar_lea.vmem (%p776_p6), %s1826_s22, 2048 }
 0x1a7   : > { %1145 = vmatpush1.msra.mxu0 %v2791_v22  ;;  %1209 = vmatprep.subr.mxu1 %v2800_v39  ;;  %3238 = vst [vmem:[#allocation87_spill] sm:$0xff] %v2820_v38  ;;  %v2825_v22 = vld [vmem:[#allocation9 + $0x78] sm:$0xff]  ;;  %vm1289_vm1 = vcmp.gt.s32.totalorder %v2254_v1, %v1288_v23  ;;  %v2856_v23 = vld [vmem:[#allocation9 + $0x10] sm:$0xff]  ;;  %p2119_p7 = scmp.ne.s32.totalorder (%p776_p6), %s1826_s22, %s2118_s23  ;;  %p2124_p9 = scmp.lt.s32.totalorder (%p776_p6), %s2118_s23, %s2118_s23 }
 0x1a8   : > { %1146 = vmatprep.subr.mxu0 %v2797_v45  ;;  %1210 = vmatpush1.msra.mxu1 %v2807_v42  ;;  %3239 = vst [vmem:[#allocation88_spill] sm:$0xff] %v2825_v22  ;;  %v2831_v45 = vld [vmem:[#allocation9 + $0x70] sm:$0xff]  ;;  %v2835_v39 = vld [vmem:[#allocation9 + $0x58] sm:$0xff] }
 0x1a9   : > { %1147 = vmatpush1.msra.mxu0 %v2804_v32  ;;  %1211 = vmatprep.subr.mxu1 %v2814_v37  ;;  %v1033_v32 = vsel %vm1032_vm0, 1, %v3240_v21  ;;  %v2840_v42 = vld [vmem:[#allocation9 + $0x50] sm:$0xff]  ;;  %p2125_p10 = por (%p776_p6), %p2124_p9, %p2123_p8 }
 0x1aa   : > { %1148 = vmatprep.subr.mxu0 %v2811_v34  ;;  %1212 = vmatpush1.msra.mxu1 %v2820_v38  ;;  %v2844_v34 = vld [vmem:[#allocation9 + $0x38] sm:$0xff] }
 0x1ab   : > { %1149 = vmatpush1.msra.mxu0 %v2817_v41  ;;  %1213 = vmatprep.subr.mxu1 %v2825_v22  ;;  %v2848_v41 = vld [vmem:[#allocation9 + $0x30] sm:$0xff]  ;;  %v2851_v38 = vld [vmem:[#allocation9 + $0x18] sm:$0xff]  ;;  %v1290_v22 = vsel %vm1289_vm1, 1, %v3240_v21  ;;  %p2126_p11 = pnand (%p776_p6), %p2125_p10, %p2119_p7 }
 0x1ac   : > { %1183 = vmatmul.mubr.f32.vlgmr.msra.gmra.mxu0 %v2172_v40  ;;  %1214 = vmatpush1.msra.mxu1 %v2831_v45 }
 0x1ad   : > { %1253 = vmatprep.mubr.f32.mxu1 %v3227_v30  ;;  %1215 = vmatprep.subr.mxu1 %v2835_v39 }
 0x1ae   : > { %1035 = vperm.xlu0 %1972, %v1033_v32   ;;  %1216 = vmatpush1.msra.mxu1 %v2840_v42 }
 0x1af   : > { %1379 = vmatprep.subr.mxu0 %v2456_v35  ;;  %1217 = vmatprep.subr.mxu1 %v2844_v34  ;;  %v3241_v35 = vld [vmem:[#allocation22_spill] sm:$0xff] }
 0x1b0   : > { %1380 = vmatpush1.msra.mxu0 %v2458_v36  ;;  %1218 = vmatpush1.msra.mxu1 %v2848_v41  ;;  %v3242_v36 = vld [vmem:[#allocation19_spill] sm:$0xff] }
 0x1b1   : > { %1381 = vmatprep.subr.mxu0 %v2460_v0  ;;  %1219 = vmatprep.subr.mxu1 %v2851_v38  ;;  %v3243_v0 = vld [vmem:[#allocation24_spill] sm:$0xff] }
 0x1b2   : > { %1292 = vperm.xlu0 %1972, %v1290_v22   ;;  %1220 = vmatpush1.msra.mxu1 %v2856_v23 }
 0x1b3   : > { %1382 = vmatpush1.msra.mxu0 %v2463_v13  ;;  %1254 = vmatmul.mubr.f32.vlgmr.msra.gmra.mxu1 %v2172_v40  ;;  %v3244_v13 = vld [vmem:[#allocation20_spill] sm:$0xff] }
 0x1b4   : > { %1450 = vmatprep.subr.mxu1 %v2481_v48  ;;  %1383 = vmatprep.subr.mxu0 %v2467_v18  ;;  %v3245_v18 = vld [vmem:[#allocation26_spill] sm:$0xff]  ;;  %v3249_v48 = vld [vmem:[#allocation31_spill] sm:$0xff] }
 0x1b5   : > { %1451 = vmatpush1.msra.mxu1 %v2487_v50  ;;  %1384 = vmatpush1.msra.mxu0 %v2471_v44  ;;  %v3246_v44 = vld [vmem:[#allocation21_spill] sm:$0xff] }
 0x1b6   : > { %1452 = vmatprep.subr.mxu1 %v2493_v52  ;;  %1385 = vmatprep.subr.mxu0 %v2475_v46  ;;  %v3247_v46 = vld [vmem:[#allocation28_spill] sm:$0xff]  ;;  %v3251_v50 = vld [vmem:[#allocation33_spill] sm:$0xff]  ;;  %v3253_v52 = vld [vmem:[#allocation35_spill] sm:$0xff] }
 0x1b7   : > { %1453 = vmatpush1.msra.mxu1 %v2495_v53  ;;  %1386 = vmatpush1.msra.mxu0 %v2479_v47  ;;  %v3248_v47 = vld [vmem:[#allocation23_spill] sm:$0xff]  ;;  %v3254_v53 = vld [vmem:[#allocation37_spill] sm:$0xff] }
 0x1b8   : > { %1454 = vmatprep.subr.mxu1 %v2501_v55  ;;  %1387 = vmatprep.subr.mxu0 %v2484_v49  ;;  %v3250_v49 = vld [vmem:[#allocation25_spill] sm:$0xff] }
 0x1b9   : > { %1455 = vmatpush1.msra.mxu1 %v2507_v57  ;;  %1388 = vmatpush1.msra.mxu0 %v2490_v51  ;;  %v3252_v51 = vld [vmem:[#allocation27_spill] sm:$0xff]  ;;  %v3256_v55 = vld [vmem:[#allocation29_spill] sm:$0xff]  ;;  %v1549_v57 = vstv %s1302_s24 }
 0x1ba   : > { %1456 = vmatprep.subr.mxu1 %v2509_v58  ;;  %1389 = vmatprep.subr.mxu0 %v2498_v54  ;;  %v3255_v54 = vld [vmem:[#allocation39_spill] sm:$0xff]  ;;  %v1806_v58 = vstv %s1303_s25  ;;  %vm1550_vm2 = vcmp.gt.s32.totalorder %v2254_v1, %v1549_v57 }
 0x1bb   : > { %1457 = vmatpush1.msra.mxu1 %v2515_v60  ;;  %1390 = vmatpush1.msra.mxu0 %v2504_v56  ;;  %v3257_v56 = vld [vmem:[#allocation41_spill] sm:$0xff]  ;;  %vm1807_vm3 = vcmp.gt.s32.totalorder %v2254_v1, %v1806_v58 }
 0x1bc   : > { %1458 = vmatprep.subr.mxu1 %v2521_v62  ;;  %1391 = vmatprep.subr.mxu0 %v2512_v59  ;;  %v1551_v59 = vsel %vm1550_vm2, 1, %v3240_v21  ;;  %v1808_v60 = vsel %vm1807_vm3, 1, %v3240_v21 }
 0x1bd   : > { %1459 = vmatpush1.msra.mxu1 %v2527_v2  ;;  %1392 = vmatpush1.msra.mxu0 %v2518_v61  ;;  %v793_v61 = vld [vmem:[%s792_s29] sm:$0xff] }
 0x1be   : > { %1460 = vmatprep.subr.mxu1 %v2533_v5  ;;  %1393 = vmatprep.subr.mxu0 %v2524_v63  ;;  %v794_v63 = vld [vmem:[%s792_s29 + $0x8] sm:$0xff] }
 0x1bf   : > { %1461 = vmatpush1.msra.mxu1 %v2539_v7  ;;  %1394 = vmatpush1.msra.mxu0 %v2530_v3 }
 0x1c0   : > { %1462 = vmatprep.subr.mxu1 %v2545_v9  ;;  %1395 = vmatprep.subr.mxu0 %v2536_v6 }
 0x1c1   : > { %1463 = vmatpush1.msra.mxu1 %v2551_v11  ;;  %1396 = vmatpush1.msra.mxu0 %v2542_v8  ;;  %v795_v8 = vld [vmem:[%s792_s29 + $0x10] sm:$0xff]  ;;  %v796_v11 = vld [vmem:[%s792_s29 + $0x18] sm:$0xff] }
 0x1c2   : > { %1464 = vmatprep.subr.mxu1 %v2557_v14  ;;  %1397 = vmatprep.subr.mxu0 %v2548_v10 }
 0x1c3   : > { %1465 = vmatpush1.msra.mxu1 %v2563_v4  ;;  %1398 = vmatpush1.msra.mxu0 %v2554_v12 }
 0x1c4   : > { %1466 = vmatprep.subr.mxu1 %v2569_v17  ;;  %1399 = vmatprep.subr.mxu0 %v2560_v15 }
 0x1c5   : > { %1467 = vmatpush1.msra.mxu1 %v2575_v20  ;;  %1400 = vmatpush1.msra.mxu0 %v2566_v16  ;;  %v1050_v20 = vld [vmem:[%s1049_s9 + $0x20] sm:$0xff] }
 0x1c6   : > { %1468 = vmatprep.subr.mxu1 %v2581_v25  ;;  %1401 = vmatprep.subr.mxu0 %v2572_v19 }
 0x1c7   : > { %1469 = vmatpush1.msra.mxu1 %v2587_v27  ;;  %1402 = vmatpush1.msra.mxu0 %v2578_v24  ;;  %v1051_v27 = vld [vmem:[%s1049_s9 + $0x28] sm:$0xff] }
 0x1c8   : > { %1470 = vmatprep.subr.mxu1 %v2593_v29  ;;  %1403 = vmatprep.subr.mxu0 %v2584_v26 }
 0x1c9   : > { %1471 = vmatpush1.msra.mxu1 %v2599_v31  ;;  %1404 = vmatpush1.msra.mxu0 %v2590_v28 }
 0x1ca   : > { %1472 = vmatprep.subr.mxu1 %v2605_v33  ;;  %1405 = vmatprep.subr.mxu0 %v3242_v36 }
 0x1cb   : > { %1473 = vmatpush1.msra.mxu1 %v3241_v35  ;;  %1406 = vmatpush1.msra.mxu0 %v3244_v13  ;;  %v3258_v13 = vld [vmem:[#allocation17_spill] sm:$0xff] }
 0x1cc   : > { %1474 = vmatprep.subr.mxu1 %v3243_v0  ;;  %1407 = vmatprep.subr.mxu0 %v3246_v44 }
 0x1cd   : > { %1475 = vmatpush1.msra.mxu1 %v3245_v18  ;;  %1408 = vmatpush1.msra.mxu0 %v3248_v47 }
 0x1ce   : > { %1476 = vmatprep.subr.mxu1 %v3247_v46  ;;  %1409 = vmatprep.subr.mxu0 %v3250_v49  ;;  %v1052_v46 = vld [vmem:[%s1049_s9 + $0x30] sm:$0xff] }
 0x1cf   : > { %1477 = vmatpush1.msra.mxu1 %v3249_v48  ;;  %1410 = vmatpush1.msra.mxu0 %v3252_v51 }
 0x1d0   : > { %1478 = vmatprep.subr.mxu1 %v3251_v50  ;;  %1443 = vmatprep.mubr.f32.mxu0 %v3227_v30  ;;  %v1053_v50 = vld [vmem:[%s1049_s9 + $0x38] sm:$0xff] }
 0x1d1   : > { %1479 = vmatpush1.msra.mxu1 %v3253_v52  ;;  %1514 = vmatprep.mubr.f32.mxu1 %v3227_v30 }
 0x1d2   : > { %1480 = vmatprep.subr.mxu1 %v3254_v53  ;;  %1636 = vmatprep.subr.mxu0 %v3256_v55 }
 0x1d3   : > { %1481 = vmatpush1.msra.mxu1 %v3255_v54  ;;  %1553 = vperm.xlu1 %1973, %v1551_v59  }
 0x1d4   : > { %1707 = vmatprep.subr.mxu1 %v3257_v56 }
 0x1d7   : > { %1810 = vperm.xlu1 %1973, %v1808_v60  }
 0x229   : > { %v1036_v21 = vpop.permute.xlu0 %1035 }
 0x22a   : > { %vm1037_vm4 = vcmp.eq.s32.totalorder %v1036_v21, 1 }
 0x24c   : > { %v927_v62 = vpop.f32.mrf.mxu0 }
 0x24d   : > { %v1003_v2 = vadd.f32 %v927_v62, %v793_v61  ;;  %v3259_v61 = vld [vmem:[#allocation18_spill] sm:$0xff] }
 0x24e   : > { %v929_v3 = vpop.f32.mrf.mxu0 }
 0x24f   : > { %v1877_v5 = vmul.f32 -1.442695, %v1003_v2  ;;  %v1004_v6 = vadd.f32 %v929_v3, %v794_v63  ;;  %v3260_v2 = vld [vmem:[#allocation30_spill] sm:$0xff]  ;;  %v3261_v3 = vld [vmem:[#allocation44_spill] sm:$0xff] }
 0x251   : > { %1974 = vpow2.f32 %v1877_v5  ;;  %v1878_v7 = vmul.f32 -1.442695, %v1004_v6  ;;  %v3262_v5 = vld [vmem:[#allocation32_spill] sm:$0xff]  ;;  %v3263_v6 = vld [vmem:[#allocation46_spill] sm:$0xff] }
 0x252   : > { %v998_v9 = vpop.f32.mrf.mxu1 }
 0x253   : > { %1976 = vpow2.f32 %v1878_v7  ;;  %v1005_v10 = vadd.f32 %v998_v9, %v795_v8  ;;  %v3264_v7 = vld [vmem:[#allocation34_spill] sm:$0xff]  ;;  %v3265_v8 = vld [vmem:[#allocation48_spill] sm:$0xff] }
 0x254   : > { %v1000_v12 = vpop.f32.mrf.mxu1  ;;  %v3266_v9 = vld [vmem:[#allocation36_spill] sm:$0xff] }
 0x255   : > { %v1879_v14 = vmul.f32 -1.442695, %v1005_v10  ;;  %v1006_v15 = vadd.f32 %v1000_v12, %v796_v11  ;;  %v3267_v10 = vld [vmem:[#allocation50_spill] sm:$0xff]  ;;  %v3269_v12 = vld [vmem:[#allocation52_spill] sm:$0xff] }
 0x256   : > { %v3268_v11 = vld [vmem:[#allocation38_spill] sm:$0xff] }
 0x257   : > { %1978 = vpow2.f32 %v1879_v14 }
 0x258   : > { %1980 = vtanh.f32 %v1006_v15  ;;  %v3270_v15 = vld [vmem:[#allocation40_spill] sm:$0xff] }
 0x25e   : > { %v1975_v4 = vpop.eup %1974 }
 0x25f   : > { %v1016_v16 = vadd.f32 1.0, %v1975_v4  ;;  %v3271_v4 = vld [vmem:[#allocation54_spill] sm:$0xff] }
 0x260   : > { %v1977_v17 = vpop.eup %1976 }
 0x261   : > { %1982 = vrcp.f32 %v1016_v16  ;;  %v1017_v19 = vadd.f32 1.0, %v1977_v17  ;;  %v3272_v17 = vld [vmem:[#allocation42_spill] sm:$0xff] }
 0x263   : > { %1984 = vrcp.f32 %v1017_v19  ;;  %v3273_v19 = vld [vmem:[#allocation56_spill] sm:$0xff] }
 0x264   : > { %v1979_v24 = vpop.eup %1978 }
 0x265   : > { %v1981_v25 = vpop.eup %1980  ;;  %v1018_v31 = vadd.f32 1.0, %v1979_v24  ;;  %v3274_v24 = vld [vmem:[#allocation43_spill] sm:$0xff] }
 0x26c   : > { %v1184_v26 = vpop.f32.mrf.mxu0 }
 0x26d   : > { %v1260_v28 = vadd.f32 %v1184_v26, %v1050_v20  ;;  %v3276_v26 = vld [vmem:[#allocation45_spill] sm:$0xff] }
 0x26e   : > { %v1983_v29 = vpop.eup %1982  ;;  %v1186_v32 = vpop.f32.mrf.mxu0 }
 0x26f   : > { %v1884_v33 = vmul.f32 -1.442695, %v1260_v28  ;;  %v1261_v22 = vadd.f32 %v1186_v32, %v1051_v27  ;;  %v1027_v35 = vmul.f32 %v1983_v29, %v1981_v25  ;;  %v3275_v25 = vld [vmem:[#allocation58_spill] sm:$0xff]  ;;  %v3277_v27 = vld [vmem:[#allocation60_spill] sm:$0xff] }
 0x270   : > { %v1985_v36 = vpop.eup %1984  ;;  %v3279_v32 = vld [vmem:[#allocation62_spill] sm:$0xff] }
 0x271   : > { %1986 = vpow2.f32 %v1884_v33  ;;  %v1885_v0 = vmul.f32 -1.442695, %v1261_v22  ;;  %v1026_v18 = vmul.f32 %v3258_v13, %v1985_v36  ;;  %v1293_v33 = vpop.permute.xlu0 %1292  ;;  %v3280_v22 = vld [vmem:[#allocation16_spill] sm:$0xff]  ;;  %v3281_v36 = vld [vmem:[#allocation49_spill] sm:$0xff] }
 0x272   : > { %1988 = vrcp.f32 %v1018_v31  ;;  %v3278_v31 = vld [vmem:[#allocation47_spill] sm:$0xff]  ;;  %vm1294_vm5 = vcmp.eq.s32.totalorder %v1293_v33, 1 }
 0x273   : > { %1990 = vpow2.f32 %v1885_v0  ;;  %v1028_v44 = vadd.f32 %v1027_v35, %v1026_v18  ;;  %v1255_v48 = vpop.f32.mrf.mxu1  ;;  %v3282_v0 = vld [vmem:[#allocation64_spill] sm:$0xff]  ;;  %v3284_v18 = vld [vmem:[#allocation66_spill] sm:$0xff] }
 0x274   : > { %v1262_v49 = vadd.f32 %v1255_v48, %v1052_v46  ;;  %v3285_v46 = vld [vmem:[#allocation53_spill] sm:$0xff]  ;;  %v3286_v48 = vld [vmem:[#allocation68_spill] sm:$0xff] }
 0x275   : > { %1992 = vtanh.f32 %v1028_v44  ;;  %v2953_v47 = vsel %vm1037_vm4, %v1028_v44, %v3258_v13  ;;  %v1257_v51 = vpop.f32.mrf.mxu1  ;;  %v3283_v13 = vld [vmem:[#allocation51_spill] sm:$0xff] }
 0x276   : > { %v1886_v52 = vmul.f32 -1.442695, %v1262_v49  ;;  %v1263_v53 = vadd.f32 %v1257_v51, %v1053_v50  ;;  %v3287_v49 = vld [vmem:[#allocation55_spill] sm:$0xff]  ;;  %v3288_v50 = vld [vmem:[#allocation70_spill] sm:$0xff] }
 0x278   : > { %1994 = vpow2.f32 %v1886_v52  ;;  %v3289_v52 = vld [vmem:[#allocation57_spill] sm:$0xff] }
 0x279   : > { %1996 = vtanh.f32 %v1263_v53  ;;  %v3290_v53 = vld [vmem:[#allocation73_spill] sm:$0xff] }
 0x27e   : > { %v1987_v54 = vpop.eup %1986 }
 0x27f   : > { %v1989_v55 = vpop.eup %1988  ;;  %v1273_v56 = vadd.f32 1.0, %v1987_v54  ;;  %v3291_v54 = vld [vmem:[#allocation59_spill] sm:$0xff] }
 0x280   : > { %v1991_v57 = vpop.eup %1990 }
 0x281   : > { %1998 = vrcp.f32 %v1273_v56  ;;  %v1274_v58 = vadd.f32 1.0, %v1991_v57  ;;  %v3293_v56 = vld [vmem:[#allocation61_spill] sm:$0xff] }
 0x282   : > { %v1993_v59 = vpop.eup %1992  ;;  %v3294_v57 = vld [vmem:[#allocation77_spill] sm:$0xff] }
 0x283   : > { %2000 = vrcp.f32 %v1274_v58  ;;  %v1030_v60 = vmul.f32 %v1993_v59, %v1989_v55  ;;  %v3292_v55 = vld [vmem:[#allocation75_spill] sm:$0xff]  ;;  %v3296_v59 = vld [vmem:[#allocation65_spill] sm:$0xff] }
 0x284   : > { %v3295_v58 = vld [vmem:[#allocation63_spill] sm:$0xff] }
 0x285   : > { %v2958_v62 = vsel %vm1037_vm4, %v1030_v60, %v3259_v61  ;;  %v1040_v63 = vsel %vm1037_vm4, %v1030_v60, 0.0  ;;  %v1995_v14 = vpop.eup %1994  ;;  %v3297_v60 = vld [vmem:[#allocation80_spill] sm:$0xff]  ;;  %v3298_v61 = vld [vmem:[#allocation67_spill] sm:$0xff] }
 0x286   : > { %1044 = vst [vmem:[%s1043_s11] sm:$0xff] %v1040_v63  ;;  %1444 = vmatmul.mubr.f32.vlgmr.msra.gmra.mxu0 %v2958_v62  ;;  %1515 = vmatmul.mubr.f32.vlgmr.msra.gmra.mxu1 %v2958_v62  ;;  %v1997_v16 = vpop.eup %1996  ;;  %v1275_v29 = vadd.f32 1.0, %v1995_v14  ;;  %v3299_v63 = vld [vmem:[#allocation82_spill] sm:$0xff]  ;;  %v3310_v14 = vld [vmem:[#allocation81_spill] sm:$0xff] }
 0x287   : > { %1637 = vmatpush1.msra.mxu0 %v3260_v2  ;;  %1708 = vmatpush1.msra.mxu1 %v3261_v3  ;;  %v3300_v2 = vld [vmem:[#allocation69_spill] sm:$0xff]  ;;  %v3301_v3 = vld [vmem:[#allocation84_spill] sm:$0xff] }
 0x288   : > { %1638 = vmatprep.subr.mxu0 %v3262_v5  ;;  %1709 = vmatprep.subr.mxu1 %v3263_v6  ;;  %2002 = vrcp.f32 %v1275_v29  ;;  %v3302_v5 = vld [vmem:[#allocation71_spill] sm:$0xff]  ;;  %v3303_v6 = vld [vmem:[#allocation72_spill] sm:$0xff] }
 0x289   : > { %1639 = vmatpush1.msra.mxu0 %v3264_v7  ;;  %1710 = vmatpush1.msra.mxu1 %v3265_v8  ;;  %v3304_v7 = vld [vmem:[#allocation87_spill] sm:$0xff]  ;;  %v3306_v8 = vld [vmem:[#allocation88_spill] sm:$0xff] }
 0x28a   : > { %1640 = vmatprep.subr.mxu0 %v3266_v9  ;;  %1711 = vmatprep.subr.mxu1 %v3267_v10  ;;  %v3307_v9 = vld [vmem:[#allocation76_spill] sm:$0xff]  ;;  %v3308_v10 = vld [vmem:[#allocation78_spill] sm:$0xff] }
 0x28b   : > { %1641 = vmatpush1.msra.mxu0 %v3268_v11  ;;  %1712 = vmatpush1.msra.mxu1 %v3269_v12 }
 0x28c   : > { %1642 = vmatprep.subr.mxu0 %v3270_v15  ;;  %1713 = vmatprep.subr.mxu1 %v3271_v4  ;;  %v3311_v4 = vld [vmem:[#allocation83_spill] sm:$0xff] }
 0x28d   : > { %1643 = vmatpush1.msra.mxu0 %v3272_v17  ;;  %1714 = vmatpush1.msra.mxu1 %v3273_v19 }
 0x28e   : > { %v1999_v20 = vpop.eup %1998  ;;  %1644 = vmatprep.subr.mxu0 %v3274_v24  ;;  %1715 = vmatprep.subr.mxu1 %v3275_v25 }
 0x28f   : > { %1645 = vmatpush1.msra.mxu0 %v3276_v26  ;;  %1716 = vmatpush1.msra.mxu1 %v3277_v27  ;;  %v1284_v35 = vmul.f32 %v1999_v20, %v1997_v16  ;;  %v3313_v16 = vld [vmem:[#allocation86_spill] sm:$0xff]  ;;  %v1314_v26 = vld [vmem:[%s1310_s16 + $0x18] sm:$0xff] }
 0x290   : > { %v2001_v28 = vpop.eup %2000  ;;  %1646 = vmatprep.subr.mxu0 %v3278_v31  ;;  %1717 = vmatprep.subr.mxu1 %v3279_v32  ;;  %v1313_v20 = vld [vmem:[%s1310_s16 + $0x10] sm:$0xff] }
 0x291   : > { %v1283_v21 = vmul.f32 %v3280_v22, %v2001_v28  ;;  %1647 = vmatpush1.msra.mxu0 %v3281_v36  ;;  %1718 = vmatpush1.msra.mxu1 %v3282_v0  ;;  %v1569_v0 = vld [vmem:[%s1567_s19 + $0x28] sm:$0xff] }
 0x292   : > { %1648 = vmatprep.subr.mxu0 %v3283_v13  ;;  %1719 = vmatprep.subr.mxu1 %v3284_v18 }
 0x293   : > { %v1285_v44 = vadd.f32 %v1284_v35, %v1283_v21  ;;  %1649 = vmatpush1.msra.mxu0 %v3285_v46  ;;  %1720 = vmatpush1.msra.mxu1 %v3286_v48  ;;  %v1568_v21 = vld [vmem:[%s1567_s19 + $0x20] sm:$0xff]  ;;  %v1554_v48 = vpop.permute.xlu1 %1553 }
 0x294   : > { %1650 = vmatprep.subr.mxu0 %v3287_v49  ;;  %1721 = vmatprep.subr.mxu1 %v3288_v50  ;;  %vm1555_vm6 = vcmp.eq.s32.totalorder %v1554_v48, 1 }
 0x295   : > { %2004 = vtanh.f32 %v1285_v44  ;;  %v2994_v51 = vsel %vm1294_vm5, %v1285_v44, %v3280_v22  ;;  %1651 = vmatpush1.msra.mxu0 %v3289_v52  ;;  %1722 = vmatpush1.msra.mxu1 %v3290_v53  ;;  %v2003_v11 = vpop.eup %2002 }
 0x296   : > { %1652 = vmatprep.subr.mxu0 %v3291_v54  ;;  %1723 = vmatprep.subr.mxu1 %v3292_v55 }
 0x297   : > { %1653 = vmatpush1.msra.mxu0 %v3293_v56  ;;  %1724 = vmatpush1.msra.mxu1 %v3294_v57 }
 0x298   : > { %1654 = vmatprep.subr.mxu0 %v3295_v58  ;;  %1725 = vmatprep.subr.mxu1 %v2788_v43  ;;  %v3305_v43 = vld [vmem:[#allocation74_spill] sm:$0xff] }
 0x299   : > { %1655 = vmatpush1.msra.mxu0 %v3296_v59  ;;  %1726 = vmatpush1.msra.mxu1 %v3297_v60  ;;  %v1570_v58 = vld [vmem:[%s1567_s19 + $0x30] sm:$0xff] }
 0x29a   : > { %1656 = vmatprep.subr.mxu0 %v3298_v61  ;;  %1727 = vmatprep.subr.mxu1 %v3299_v63  ;;  %v1571_v61 = vld [vmem:[%s1567_s19 + $0x38] sm:$0xff] }
 0x29b   : > { %1657 = vmatpush1.msra.mxu0 %v3300_v2  ;;  %1728 = vmatpush1.msra.mxu1 %v3301_v3 }
 0x29c   : > { %1658 = vmatprep.subr.mxu0 %v3302_v5  ;;  %1729 = vmatprep.subr.mxu1 %v2814_v37  ;;  %v3309_v37 = vld [vmem:[#allocation79_spill] sm:$0xff] }
 0x29d   : > { %1659 = vmatpush1.msra.mxu0 %v3303_v6  ;;  %1730 = vmatpush1.msra.mxu1 %v3304_v7 }
 0x29e   : > { %1660 = vmatprep.subr.mxu0 %v3305_v43  ;;  %1731 = vmatprep.subr.mxu1 %v3306_v8 }
 0x29f   : > { %1661 = vmatpush1.msra.mxu0 %v3307_v9  ;;  %1732 = vmatpush1.msra.mxu1 %v2831_v45  ;;  %v3312_v45 = vld [vmem:[#allocation85_spill] sm:$0xff] }
 0x2a0   : > { %1662 = vmatprep.subr.mxu0 %v3308_v10  ;;  %1733 = vmatprep.subr.mxu1 %v2835_v39 }
 0x2a1   : > { %1663 = vmatpush1.msra.mxu0 %v3309_v37  ;;  %1734 = vmatpush1.msra.mxu1 %v2840_v42 }
 0x2a2   : > { %v2005_v12 = vpop.eup %2004  ;;  %1664 = vmatprep.subr.mxu0 %v3310_v14  ;;  %1735 = vmatprep.subr.mxu1 %v2844_v34  ;;  %v1312_v34 = vld [vmem:[%s1310_s16 + $0x8] sm:$0xff]  ;;  %v1811_v14 = vpop.permute.xlu1 %1810 }
 0x2a3   : > { %v1287_v15 = vmul.f32 %v2005_v12, %v2003_v11  ;;  %1665 = vmatpush1.msra.mxu0 %v3311_v4  ;;  %1736 = vmatpush1.msra.mxu1 %v2848_v41  ;;  %vm1812_vm7 = vcmp.eq.s32.totalorder %v1811_v14, 1 }
 0x2a4   : > { %1666 = vmatprep.subr.mxu0 %v3312_v45  ;;  %1737 = vmatprep.subr.mxu1 %v2851_v38 }
 0x2a5   : > { %v3032_v39 = vsel %vm1294_vm5, %v1287_v15, %v2172_v40  ;;  %v1297_v42 = vsel %vm1294_vm5, %v1287_v15, 0.0  ;;  %1667 = vmatpush1.msra.mxu0 %v3313_v16  ;;  %1700 = vmatprep.mubr.f32.mxu0 %v3227_v30  ;;  %v1311_v40 = vld [vmem:[%s1310_s16] sm:$0xff] }
 0x2a6   : > { %1301 = vst [vmem:[%s1300_s2 + $0x8] sm:$0xff] %v1297_v42  ;;  %1738 = vmatpush1.msra.mxu1 %v2856_v23  ;;  %1771 = vmatprep.mubr.f32.mxu1 %v3227_v30 }
 0x2a7   : > { %1701 = vmatmul.mubr.f32.vlgmr.msra.gmra.mxu0 %v3032_v39  ;;  %1772 = vmatmul.mubr.f32.vlgmr.msra.gmra.mxu1 %v3032_v39 }
 0x346   : > { %v1445_v41 = vpop.f32.mrf.mxu0  ;;  %v1516_v24 = vpop.f32.mrf.mxu1 }
 0x347   : > { %v1521_v38 = vadd.f32 %v1445_v41, %v1311_v40  ;;  %v1523_v25 = vadd.f32 %v1516_v24, %v1313_v20 }
 0x348   : > { %v1447_v23 = vpop.f32.mrf.mxu0  ;;  %v1518_v27 = vpop.f32.mrf.mxu1 }
 0x349   : > { %v1893_v30 = vmul.f32 -1.442695, %v1521_v38  ;;  %v1522_v17 = vadd.f32 %v1447_v23, %v1312_v34  ;;  %v1895_v28 = vmul.f32 -1.442695, %v1523_v25  ;;  %v1524_v31 = vadd.f32 %v1518_v27, %v1314_v26 }
 0x34b   : > { %2006 = vpow2.f32 %v1893_v30  ;;  %v1894_v19 = vmul.f32 -1.442695, %v1522_v17 }
 0x34d   : > { %2008 = vpow2.f32 %v1894_v19 }
 0x34e   : > { %2010 = vpow2.f32 %v1895_v28 }
 0x358   : > { %v2007_v29 = vpop.eup %2006 }
 0x359   : > { %v1534_v32 = vadd.f32 1.0, %v2007_v29 }
 0x35a   : > { %v2009_v33 = vpop.eup %2008 }
 0x35b   : > { %2012 = vrcp.f32 %v1534_v32  ;;  %v1535_v22 = vadd.f32 1.0, %v2009_v33  ;;  %v2011_v35 = vpop.eup %2010 }
 0x35c   : > { %2014 = vtanh.f32 %v1524_v31  ;;  %v1536_v53 = vadd.f32 1.0, %v2011_v35 }
 0x35d   : > { %2016 = vrcp.f32 %v1535_v22 }
 0x367   : > { %v1702_v36 = vpop.f32.mrf.mxu0  ;;  %v1773_v59 = vpop.f32.mrf.mxu1 }
 0x368   : > { %v2013_v13 = vpop.eup %2012  ;;  %v1778_v18 = vadd.f32 %v1702_v36, %v1568_v21  ;;  %v1780_v60 = vadd.f32 %v1773_v59, %v1570_v58 }
 0x369   : > { %v2015_v44 = vpop.eup %2014  ;;  %v1704_v46 = vpop.f32.mrf.mxu0 }
 0x36a   : > { %v2017_v49 = vpop.eup %2016  ;;  %v1900_v50 = vmul.f32 -1.442695, %v1778_v18  ;;  %v1779_v52 = vadd.f32 %v1704_v46, %v1569_v0  ;;  %v1545_v55 = vmul.f32 %v2015_v44, %v2013_v13  ;;  %v1775_v63 = vpop.f32.mrf.mxu1  ;;  %v1902_v2 = vmul.f32 -1.442695, %v1780_v60 }
 0x36b   : > { %v1544_v54 = vmul.f32 %v2017_v49, %v2953_v47  ;;  %v1781_v5 = vadd.f32 %v1775_v63, %v1571_v61 }
 0x36c   : > { %2018 = vpow2.f32 %v1900_v50  ;;  %v1901_v56 = vmul.f32 -1.442695, %v1779_v52 }
 0x36d   : > { %v1546_v57 = vadd.f32 %v1545_v55, %v1544_v54 }
 0x36e   : > { %2020 = vpow2.f32 %v1901_v56 }
 0x36f   : > { %2022 = vrcp.f32 %v1536_v53  ;;  %v1557_v41 = vsel %vm1555_vm6, %v1546_v57, %v2953_v47  }
 0x370   : > { %2024 = vtanh.f32 %v1546_v57 }
 0x371   : > { %2026 = vpow2.f32 %v1902_v2 }
 0x379   : > { %v2019_v3 = vpop.eup %2018 }
 0x37a   : > { %v1791_v6 = vadd.f32 1.0, %v2019_v3 }
 0x37b   : > { %v2021_v7 = vpop.eup %2020 }
 0x37c   : > { %v2023_v43 = vpop.eup %2022  ;;  %2028 = vrcp.f32 %v1791_v6  ;;  %v1792_v8 = vadd.f32 1.0, %v2021_v7 }
 0x37d   : > { %v2025_v9 = vpop.eup %2024  ;;  %2030 = vtanh.f32 %v1781_v5 }
 0x37e   : > { %2032 = vrcp.f32 %v1792_v8  ;;  %v1548_v47 = vmul.f32 %v2025_v9, %v2023_v43  ;;  %v2027_v11 = vpop.eup %2026 }
 0x37f   : > { %v1793_v4 = vadd.f32 1.0, %v2027_v11 }
 0x380   : > { %v1556_v42 = vsel %vm1555_vm6, %v1548_v47, %v2958_v62   ;;  %v1558_v10 = vsel %vm1555_vm6, %v1548_v47, 0.0 }
 0x381   : > { %1562 = vst [vmem:[%s1561_s4] sm:$0xff] %v1558_v10  ;;  %2034 = vrcp.f32 %v1793_v4 }
 0x389   : > { %v2029_v37 = vpop.eup %2028 }
 0x38a   : > { %v2031_v12 = vpop.eup %2030 }
 0x38b   : > { %v2033_v15 = vpop.eup %2032  ;;  %v1802_v16 = vmul.f32 %v2031_v12, %v2029_v37 }
 0x38c   : > { %v1801_v45 = vmul.f32 %v2033_v15, %v2994_v51 }
 0x38e   : > { %v1803_v40 = vadd.f32 %v1802_v16, %v1801_v45  ;;  %v2035_v34 = vpop.eup %2034 }
 0x390   : > { %2036 = vtanh.f32 %v1803_v40  ;;  %v1814_v62 = vsel %vm1812_vm7, %v1803_v40, %v2994_v51  }
 0x39d   : > { %v2037_v38 = vpop.eup %2036  ;;  %778 = sbr.rel (!%p776_p6) target bundleno = 363 (0x16b), region = 75 }
 0x39e   : > { %v1805_v23 = vmul.f32 %v2037_v38, %v2035_v34 }
 0x3a0   : > { %v1813_v40 = vsel %vm1812_vm7, %v1805_v23, %v3032_v39   ;;  %v1815_v30 = vsel %vm1812_vm7, %v1805_v23, 0.0  ;;  %v3314_v39 = vmov %v1814_v62 }
 0x3a1   : > { %1819 = vst [vmem:[%s1818_s1 + $0x8] sm:$0xff] %v1815_v30 }
 0x3a2   :  { %2129 = shalt.err (!%p2126_p11)
}
 0x3a3   :  { %s2200_s24 = smov 256   ;;  %s2201_s25 = smov 16  }
 0x3a4   :  { %1831 = dma.vmem_to_hbm [thread:$0]  %s1826_s22, 2048, %s3088_s6, [#allocation5], %s2200_s24, %s2200_s24, %s2201_s25  }
 0x3a5   :  { %2164 = dma.done.wait [#allocation5], 2048  }
 0x3a6   :  { %2165 = vsyncadd [#allocation5], 4294965248 }
 0x3a7   :  { %1835 = vsyncpa [#allocation4], 1 }
 0x3a8   :  { %1836 = vsyncpa [#allocation7], 1 }
 0x3a9   :  { %1837 = vsyncpa [#allocation10], 1 }
 0x3aa   :  { %1838 = vsyncpa [#allocation5], 1 }

</bundles_post_ra>
